<compile_context>
chip_gen: v7x
topology: tpu7x:2x2x1
jax: 0.10.0
libtpu: 0.0.40
codegen_flags: <defaults>
</compile_context>

<pallas_src>
import jax
import jax.numpy as jnp
from jax import lax
from jax.experimental import pallas as pl
from jax.experimental.pallas import tpu as pltpu


def mlp_kernel(x_ref, w1_ref, w2_ref, w3_ref, w4_ref, b_ref, o_ref):
    tm = x_ref.shape[0]
    TC = 256 if tm % 256 == 0 else tm      # row chunk inside the tile
    nchunks = tm // TC

    # Tiny constants, hoisted once per grid step.
    w1r0 = w1_ref[0:1, :]                  # (1, 128) f32
    w1r1 = w1_ref[1:2, :]                  # (1, 128) f32
    b1 = b_ref[0:1, :]                     # (1, 128) f32
    b2 = b_ref[1:2, :]
    b3 = b_ref[2:3, :]
    b4 = b_ref[3:4, 0:2]                   # (1, 2)   f32

    def chunk_body(r):
        # r: start row of this chunk (multiple of TC).
        x = x_ref[pl.ds(r, TC), :]         # (TC, 2) f32

        # --- Layer 1 (in=2): K=2 is far too thin for the MXU -> two VPU
        #     broadcast FMAs (outer products), exact f32.
        h = x[:, 0:1] * w1r0 + x[:, 1:2] * w1r1 + b1      # (TC, 128) f32
        h = jnp.maximum(h, 0.0).astype(jnp.bfloat16)      # end f32 live range now

        # --- Layers 2 & 3 (128x128): weight is the stationary RHS, the batch
        #     streams as LHS.  bf16 MXU inputs, f32 accumulation; bias+ReLU in
        #     f32, immediate bf16 cast.
        h = jnp.dot(h, w2_ref[...], preferred_element_type=jnp.float32)
        h = jnp.maximum(h + b2, 0.0).astype(jnp.bfloat16)

        h = jnp.dot(h, w3_ref[...], preferred_element_type=jnp.float32)
        h = jnp.maximum(h + b3, 0.0).astype(jnp.bfloat16)

        # --- Layer 4 (out=2): bf16 MXU inputs, f32 accumulation (no emulated
        #     f32 matmul on the critical path before the store).
        y = jnp.dot(h, w4_ref[...], preferred_element_type=jnp.float32) + b4

        o_ref[pl.ds(r, TC), :] = y.astype(o_ref.dtype)    # (TC, 2)

    if nchunks == 1:
        chunk_body(0)
    else:
        # Unrolled inner loop: big grid tile for DMA/step-overhead amortization,
        # small per-chunk working set for zero spills.
        lax.fori_loop(
            0, nchunks,
            lambda c, carry: chunk_body(pl.multiple_of(c * TC, TC)),
            None, unroll=True)


def _pick_tm(n):
    """Default batch tile: 512, shrunk (>=128) only so the grid has >=2 steps
    (pipelining overlap; both v7x TensorCores get work)."""
    tm = 512
    while tm > 128 and (n + tm - 1) // tm < 2:
        tm //= 2
    return tm


def implicit_model_forward(x, params, *, tm=None):
    """x: (N, 2) float32.  params: w1..w4 as (in, out), b1..b4 as (1, out).

    Returns (N, 2) float32 -- same semantics as the PyTorch module.
    """
    N, din = x.shape
    assert din == 2
    if tm is None:
        tm = _pick_tm(N)
    assert tm % 128 == 0, "tm must be a multiple of 128"

    # Pad ragged batches up to a multiple of tm; padded rows are dropped below.
    n_pad = ((N + tm - 1) // tm) * tm
    x_p = x if n_pad == N else jnp.pad(x, ((0, n_pad - N), (0, 0)))

    f32, bf16 = jnp.float32, jnp.bfloat16
    w1 = params["w1"].astype(f32)                         # (2, 128)   exact VPU layer
    w2 = params["w2"].astype(bf16)                        # (128, 128) bf16 MXU RHS
    w3 = params["w3"].astype(bf16)                        # (128, 128) bf16 MXU RHS
    w4 = params["w4"].astype(bf16)                        # (128, 2)   bf16 MXU RHS

    # Pack all biases into one (4, 128) f32 ref; row 3 holds the 2-wide b4.
    b_pack = jnp.zeros((4, 128), f32)
    b_pack = b_pack.at[0, :].set(params["b1"].reshape(128).astype(f32))
    b_pack = b_pack.at[1, :].set(params["b2"].reshape(128).astype(f32))
    b_pack = b_pack.at[2, :].set(params["b3"].reshape(128).astype(f32))
    b_pack = b_pack.at[3, 0:2].set(params["b4"].reshape(2).astype(f32))

    grid = (n_pad // tm,)

    def const_spec(arr):
        # Weights/biases: same block every grid step (resident in VMEM).
        return pl.BlockSpec(arr.shape, lambda i: (0, 0))

    weight_bytes = sum(int(a.size) * a.dtype.itemsize
                       for a in (w1, w2, w3, w4, b_pack))
    flops = 2 * n_pad * (2 * 128 + 128 * 128 + 128 * 128 + 128 * 2)
    bytes_accessed = 2 * (n_pad * 2 * 4) + weight_bytes   # x in + y out + weights

    out = pl.pallas_call(
        mlp_kernel,
        out_shape=jax.ShapeDtypeStruct((n_pad, 2), x.dtype),
        grid_spec=pltpu.PrefetchScalarGridSpec(
            num_scalar_prefetch=0,
            grid=grid,
            in_specs=[
                pl.BlockSpec((tm, 2), lambda i: (i, 0)),   # x tile (batch-major)
                const_spec(w1),
                const_spec(w2),
                const_spec(w3),
                const_spec(w4),
                const_spec(b_pack),
            ],
            out_specs=pl.BlockSpec((tm, 2), lambda i: (i, 0)),
        ),
        compiler_params=pltpu.CompilerParams(
            dimension_semantics=("parallel",),             # megacore sharding on v7x
        ),
        cost_estimate=pl.CostEstimate(
            flops=flops, transcendentals=0, bytes_accessed=bytes_accessed),
    )(x_p, w1, w2, w3, w4, b_pack)

    return out if n_pad == N else out[:N]


def init_params(key):
    """Deterministic synthetic init (uniform, PyTorch-Linear-like scale)."""
    dims = [(2, 128), (128, 128), (128, 128), (128, 2)]
    params = {}
    keys = jax.random.split(key, 2 * len(dims))
    for idx, (din, dout) in enumerate(dims):
        bound = 1.0 / (din ** 0.5)
        wk, bk = keys[2 * idx], keys[2 * idx + 1]
        params[f"w{idx+1}"] = jax.random.uniform(
            wk, (din, dout), jnp.float32, minval=-bound, maxval=bound)
        params[f"b{idx+1}"] = jax.random.uniform(
            bk, (1, dout), jnp.float32, minval=-bound, maxval=bound)
    return params


def reference_forward(x, params):
    """Pure-JAX f32 reference, identical math to the PyTorch module."""
    h = x
    for i in range(1, 5):
        h = h @ params[f"w{i}"] + params[f"b{i}"]
        if i < 4:
            h = jnp.maximum(h, 0.0)
    return h


if __name__ == "__main__":
    key = jax.random.PRNGKey(0)
    pkey, xkey = jax.random.split(key)
    params = init_params(pkey)

    # Ragged batch on purpose: 4000 pads to 4096 -> 8 grid steps at tm=512,
    # exercising the padding path, the pipeline (>=2 steps) and both v7x TCs.
    N = 4000
    x = jax.random.normal(xkey, (N, 2), jnp.float32)

    out = implicit_model_forward(x, params)
    out = jax.block_until_ready(out)

    ref = reference_forward(x, params)
    assert out.shape == (N, 2)
    # bf16 MXU inputs on layers 2-4 -> looser tolerance than pure f32.
    assert jnp.allclose(out, ref, atol=5e-2, rtol=5e-2), "mismatch vs pure-JAX reference"

    # Also exercise the small-batch path (tm auto-shrinks to keep >=2 grid steps).
    x_small = x[:300]
    out_small = jax.block_until_ready(implicit_model_forward(x_small, params))
    assert jnp.allclose(out_small, ref[:300], atol=5e-2, rtol=5e-2)

    print("KERNEL_OK")
</pallas_src>

<mosaic_0001>
module attributes {stable_mosaic.version = 11 : i64} {
  func.func @mlp_kernel(%arg0: i32, %arg1: memref<512x2xf32, #tpu.memory_space<vmem>>, %arg2: memref<2x128xf32, #tpu.memory_space<vmem>>, %arg3: memref<128x128xbf16, #tpu.memory_space<vmem>>, %arg4: memref<128x128xbf16, #tpu.memory_space<vmem>>, %arg5: memref<128x2xbf16, #tpu.memory_space<vmem>>, %arg6: memref<4x128xf32, #tpu.memory_space<vmem>>, %arg7: memref<512x2xf32, #tpu.memory_space<vmem>>) attributes {dimension_semantics = [#tpu.dimension_semantics<parallel>], iteration_bounds = array<i64: 8>, scalar_prefetch = 0 : i64, scratch_operands = 0 : i64, tpu.core_type = #tpu.core_type<tc>, window_params = [{transform_indices = @transform_0, window_bounds = array<i64: 512, 2>}, {pipeline_mode = #tpu.pipeline_mode<synchronous>, transform_indices = @transform_1, window_bounds = array<i64: 2, 128>}, {pipeline_mode = #tpu.pipeline_mode<synchronous>, transform_indices = @transform_2, window_bounds = array<i64: 128, 128>}, {pipeline_mode = #tpu.pipeline_mode<synchronous>, transform_indices = @transform_3, window_bounds = array<i64: 128, 128>}, {pipeline_mode = #tpu.pipeline_mode<synchronous>, transform_indices = @transform_4, window_bounds = array<i64: 128, 2>}, {pipeline_mode = #tpu.pipeline_mode<synchronous>, transform_indices = @transform_5, window_bounds = array<i64: 4, 128>}, {transform_indices = @transform_6, window_bounds = array<i64: 512, 2>}]} {
    %c0 = arith.constant 0 : index
    %c0_0 = arith.constant 0 : index
    %0 = vector.load %arg2[%c0, %c0_0] : memref<2x128xf32, #tpu.memory_space<vmem>>, vector<1x128xf32>
    %c1 = arith.constant 1 : index
    %c0_1 = arith.constant 0 : index
    %1 = vector.load %arg2[%c1, %c0_1] : memref<2x128xf32, #tpu.memory_space<vmem>>, vector<1x128xf32>
    %c0_2 = arith.constant 0 : index
    %c0_3 = arith.constant 0 : index
    %2 = vector.load %arg6[%c0_2, %c0_3] : memref<4x128xf32, #tpu.memory_space<vmem>>, vector<1x128xf32>
    %c1_4 = arith.constant 1 : index
    %c0_5 = arith.constant 0 : index
    %3 = vector.load %arg6[%c1_4, %c0_5] : memref<4x128xf32, #tpu.memory_space<vmem>>, vector<1x128xf32>
    %c2 = arith.constant 2 : index
    %c0_6 = arith.constant 0 : index
    %4 = vector.load %arg6[%c2, %c0_6] : memref<4x128xf32, #tpu.memory_space<vmem>>, vector<1x128xf32>
    %c3 = arith.constant 3 : index
    %c0_7 = arith.constant 0 : index
    %5 = vector.load %arg6[%c3, %c0_7] : memref<4x128xf32, #tpu.memory_space<vmem>>, vector<1x2xf32>
    %c0_i32 = arith.constant 0 : i32
    %c256_i32 = arith.constant 256 : i32
    %6 = arith.muli %c0_i32, %c256_i32 : i32
    %7 = tpu.assume_multiple %6, 256 : i32
    %8 = arith.index_cast %7 : i32 to index
    %c0_8 = arith.constant 0 : index
    %9 = vector.load %arg1[%8, %c0_8] : memref<512x2xf32, #tpu.memory_space<vmem>>, vector<256x2xf32>
    %10 = vector.extract_strided_slice %9 {offsets = [0, 0], sizes = [256, 1], strides = [1, 1]} : vector<256x2xf32> to vector<256x1xf32>
    %11 = vector.broadcast %10 : vector<256x1xf32> to vector<256x128xf32>
    %12 = vector.broadcast %0 : vector<1x128xf32> to vector<256x128xf32>
    %13 = arith.mulf %11, %12 : vector<256x128xf32>
    %14 = vector.extract_strided_slice %9 {offsets = [0, 1], sizes = [256, 1], strides = [1, 1]} : vector<256x2xf32> to vector<256x1xf32>
    %15 = vector.broadcast %14 : vector<256x1xf32> to vector<256x128xf32>
    %16 = vector.broadcast %1 : vector<1x128xf32> to vector<256x128xf32>
    %17 = arith.mulf %15, %16 : vector<256x128xf32>
    %18 = arith.addf %13, %17 : vector<256x128xf32>
    %19 = vector.broadcast %2 : vector<1x128xf32> to vector<256x128xf32>
    %20 = arith.addf %18, %19 : vector<256x128xf32>
    %cst = arith.constant 0.000000e+00 : f32
    %21 = vector.broadcast %cst : f32 to vector<256x128xf32>
    %22 = arith.maximumf %20, %21 : vector<256x128xf32>
    %23 = arith.truncf %22 : vector<256x128xf32> to vector<256x128xbf16>
    %c0_9 = arith.constant 0 : index
    %c0_10 = arith.constant 0 : index
    %24 = vector.load %arg3[%c0_9, %c0_10] : memref<128x128xbf16, #tpu.memory_space<vmem>>, vector<128x128xbf16>
    %cst_11 = arith.constant dense<0.000000e+00> : vector<256x128xf32>
    %25 = tpu.matmul %23, %24, %cst_11 {dimension_numbers = #tpu.dot_dimension_numbers<[1], [0], [0], [1], [0, 0, 1, 1], [], []>} : vector<256x128xbf16>, vector<128x128xbf16>, vector<256x128xf32> -> vector<256x128xf32>
    %26 = vector.broadcast %3 : vector<1x128xf32> to vector<256x128xf32>
    %27 = arith.addf %25, %26 : vector<256x128xf32>
    %cst_12 = arith.constant 0.000000e+00 : f32
    %28 = vector.broadcast %cst_12 : f32 to vector<256x128xf32>
    %29 = arith.maximumf %27, %28 : vector<256x128xf32>
    %30 = arith.truncf %29 : vector<256x128xf32> to vector<256x128xbf16>
    %c0_13 = arith.constant 0 : index
    %c0_14 = arith.constant 0 : index
    %31 = vector.load %arg4[%c0_13, %c0_14] : memref<128x128xbf16, #tpu.memory_space<vmem>>, vector<128x128xbf16>
    %cst_15 = arith.constant dense<0.000000e+00> : vector<256x128xf32>
    %32 = tpu.matmul %30, %31, %cst_15 {dimension_numbers = #tpu.dot_dimension_numbers<[1], [0], [0], [1], [0, 0, 1, 1], [], []>} : vector<256x128xbf16>, vector<128x128xbf16>, vector<256x128xf32> -> vector<256x128xf32>
    %33 = vector.broadcast %4 : vector<1x128xf32> to vector<256x128xf32>
    %34 = arith.addf %32, %33 : vector<256x128xf32>
    %cst_16 = arith.constant 0.000000e+00 : f32
    %35 = vector.broadcast %cst_16 : f32 to vector<256x128xf32>
    %36 = arith.maximumf %34, %35 : vector<256x128xf32>
    %37 = arith.truncf %36 : vector<256x128xf32> to vector<256x128xbf16>
    %c0_17 = arith.constant 0 : index
    %c0_18 = arith.constant 0 : index
    %38 = vector.load %arg5[%c0_17, %c0_18] : memref<128x2xbf16, #tpu.memory_space<vmem>>, vector<128x2xbf16>
    %cst_19 = arith.constant dense<0.000000e+00> : vector<256x2xf32>
    %39 = tpu.matmul %37, %38, %cst_19 {dimension_numbers = #tpu.dot_dimension_numbers<[1], [0], [0], [1], [0, 0, 1, 1], [], []>} : vector<256x128xbf16>, vector<128x2xbf16>, vector<256x2xf32> -> vector<256x2xf32>
    %40 = vector.broadcast %5 : vector<1x2xf32> to vector<256x2xf32>
    %41 = arith.addf %39, %40 : vector<256x2xf32>
    %42 = arith.index_cast %7 : i32 to index
    %c0_20 = arith.constant 0 : index
    %43 = vector.load %arg7[%42, %c0_20] : memref<512x2xf32, #tpu.memory_space<vmem>>, vector<256x2xf32>
    tpu.vector_store %arg7[%42, %c0_20], %41 {strides = array<i32>} : memref<512x2xf32, #tpu.memory_space<vmem>>, vector<256x2xf32>,
    %c1_i32 = arith.constant 1 : i32
    %c256_i32_21 = arith.constant 256 : i32
    %44 = arith.muli %c1_i32, %c256_i32_21 : i32
    %45 = tpu.assume_multiple %44, 256 : i32
    %46 = arith.index_cast %45 : i32 to index
    %c0_22 = arith.constant 0 : index
    %47 = vector.load %arg1[%46, %c0_22] : memref<512x2xf32, #tpu.memory_space<vmem>>, vector<256x2xf32>
    %48 = vector.extract_strided_slice %47 {offsets = [0, 0], sizes = [256, 1], strides = [1, 1]} : vector<256x2xf32> to vector<256x1xf32>
    %49 = vector.broadcast %48 : vector<256x1xf32> to vector<256x128xf32>
    %50 = vector.broadcast %0 : vector<1x128xf32> to vector<256x128xf32>
    %51 = arith.mulf %49, %50 : vector<256x128xf32>
    %52 = vector.extract_strided_slice %47 {offsets = [0, 1], sizes = [256, 1], strides = [1, 1]} : vector<256x2xf32> to vector<256x1xf32>
    %53 = vector.broadcast %52 : vector<256x1xf32> to vector<256x128xf32>
    %54 = vector.broadcast %1 : vector<1x128xf32> to vector<256x128xf32>
    %55 = arith.mulf %53, %54 : vector<256x128xf32>
    %56 = arith.addf %51, %55 : vector<256x128xf32>
    %57 = vector.broadcast %2 : vector<1x128xf32> to vector<256x128xf32>
    %58 = arith.addf %56, %57 : vector<256x128xf32>
    %cst_23 = arith.constant 0.000000e+00 : f32
    %59 = vector.broadcast %cst_23 : f32 to vector<256x128xf32>
    %60 = arith.maximumf %58, %59 : vector<256x128xf32>
    %61 = arith.truncf %60 : vector<256x128xf32> to vector<256x128xbf16>
    %c0_24 = arith.constant 0 : index
    %c0_25 = arith.constant 0 : index
    %62 = vector.load %arg3[%c0_24, %c0_25] : memref<128x128xbf16, #tpu.memory_space<vmem>>, vector<128x128xbf16>
    %cst_26 = arith.constant dense<0.000000e+00> : vector<256x128xf32>
    %63 = tpu.matmul %61, %62, %cst_26 {dimension_numbers = #tpu.dot_dimension_numbers<[1], [0], [0], [1], [0, 0, 1, 1], [], []>} : vector<256x128xbf16>, vector<128x128xbf16>, vector<256x128xf32> -> vector<256x128xf32>
    %64 = vector.broadcast %3 : vector<1x128xf32> to vector<256x128xf32>
    %65 = arith.addf %63, %64 : vector<256x128xf32>
    %cst_27 = arith.constant 0.000000e+00 : f32
    %66 = vector.broadcast %cst_27 : f32 to vector<256x128xf32>
    %67 = arith.maximumf %65, %66 : vector<256x128xf32>
    %68 = arith.truncf %67 : vector<256x128xf32> to vector<256x128xbf16>
    %c0_28 = arith.constant 0 : index
    %c0_29 = arith.constant 0 : index
    %69 = vector.load %arg4[%c0_28, %c0_29] : memref<128x128xbf16, #tpu.memory_space<vmem>>, vector<128x128xbf16>
    %cst_30 = arith.constant dense<0.000000e+00> : vector<256x128xf32>
    %70 = tpu.matmul %68, %69, %cst_30 {dimension_numbers = #tpu.dot_dimension_numbers<[1], [0], [0], [1], [0, 0, 1, 1], [], []>} : vector<256x128xbf16>, vector<128x128xbf16>, vector<256x128xf32> -> vector<256x128xf32>
    %71 = vector.broadcast %4 : vector<1x128xf32> to vector<256x128xf32>
    %72 = arith.addf %70, %71 : vector<256x128xf32>
    %cst_31 = arith.constant 0.000000e+00 : f32
    %73 = vector.broadcast %cst_31 : f32 to vector<256x128xf32>
    %74 = arith.maximumf %72, %73 : vector<256x128xf32>
    %75 = arith.truncf %74 : vector<256x128xf32> to vector<256x128xbf16>
    %c0_32 = arith.constant 0 : index
    %c0_33 = arith.constant 0 : index
    %76 = vector.load %arg5[%c0_32, %c0_33] : memref<128x2xbf16, #tpu.memory_space<vmem>>, vector<128x2xbf16>
    %cst_34 = arith.constant dense<0.000000e+00> : vector<256x2xf32>
    %77 = tpu.matmul %75, %76, %cst_34 {dimension_numbers = #tpu.dot_dimension_numbers<[1], [0], [0], [1], [0, 0, 1, 1], [], []>} : vector<256x128xbf16>, vector<128x2xbf16>, vector<256x2xf32> -> vector<256x2xf32>
    %78 = vector.broadcast %5 : vector<1x2xf32> to vector<256x2xf32>
    %79 = arith.addf %77, %78 : vector<256x2xf32>
    %80 = arith.index_cast %45 : i32 to index
    %c0_35 = arith.constant 0 : index
    %81 = vector.load %arg7[%80, %c0_35] : memref<512x2xf32, #tpu.memory_space<vmem>>, vector<256x2xf32>
    tpu.vector_store %arg7[%80, %c0_35], %79 {strides = array<i32>} : memref<512x2xf32, #tpu.memory_space<vmem>>, vector<256x2xf32>,
    %c2_i32 = arith.constant 2 : i32
    return
  }
  func.func @transform_0(%arg0: i32) -> (i32, i32) {
    %c0_i32 = arith.constant 0 : i32
    %c0_i32_0 = arith.constant 0 : i32
    return %arg0, %c0_i32 : i32, i32
  }
  func.func @transform_1(%arg0: i32) -> (i32, i32) {
    %c0_i32 = arith.constant 0 : i32
    %c0_i32_0 = arith.constant 0 : i32
    %c0_i32_1 = arith.constant 0 : i32
    return %c0_i32, %c0_i32_0 : i32, i32
  }
  func.func @transform_2(%arg0: i32) -> (i32, i32) {
    %c0_i32 = arith.constant 0 : i32
    %c0_i32_0 = arith.constant 0 : i32
    %c0_i32_1 = arith.constant 0 : i32
    return %c0_i32, %c0_i32_0 : i32, i32
  }
  func.func @transform_3(%arg0: i32) -> (i32, i32) {
    %c0_i32 = arith.constant 0 : i32
    %c0_i32_0 = arith.constant 0 : i32
    %c0_i32_1 = arith.constant 0 : i32
    return %c0_i32, %c0_i32_0 : i32, i32
  }
  func.func @transform_4(%arg0: i32) -> (i32, i32) {
    %c0_i32 = arith.constant 0 : i32
    %c0_i32_0 = arith.constant 0 : i32
    %c0_i32_1 = arith.constant 0 : i32
    return %c0_i32, %c0_i32_0 : i32, i32
  }
  func.func @transform_5(%arg0: i32) -> (i32, i32) {
    %c0_i32 = arith.constant 0 : i32
    %c0_i32_0 = arith.constant 0 : i32
    %c0_i32_1 = arith.constant 0 : i32
    return %c0_i32, %c0_i32_0 : i32, i32
  }
  func.func @transform_6(%arg0: i32) -> (i32, i32) {
    %c0_i32 = arith.constant 0 : i32
    %c0_i32_0 = arith.constant 0 : i32
    return %arg0, %c0_i32 : i32, i32
  }
}

</mosaic_0001>

<bundles_post_ra>
// kernel: tpu_custom_call.1
= control target key start
LH: loop header
LB: loop body
LE: loop exit
PB: predicated region body
PF: predicated region fallthrough
CT: control target
= control target key end

     0   :  { %s3680_s21 = smov 0   ;;  %s4772_s0 = inlined_call_operand.vmem [shape: f32[4096,2], index: 0, kind: input, shape index: {}]   ;;  %s4773_s1 = inlined_call_operand.vmem [shape: f32[2,128], index: 1, kind: input, shape index: {}]   ;;  %s4774_s2 = inlined_call_operand.vmem [shape: bf16[128,128], index: 2, kind: input, shape index: {}]   ;;  %s4775_s3 = inlined_call_operand.vmem [shape: bf16[128,128], index: 3, kind: input, shape index: {}]   ;;  %s4776_s4 = inlined_call_operand.vmem [shape: bf16[128,2], index: 4, kind: input, shape index: {}]   ;;  %s4777_s5 = inlined_call_operand.vmem [shape: f32[4,128], index: 5, kind: input, shape index: {}]   ;;  %s4778_s6 = inlined_call_operand.vmem [shape: f32[4096,2], index: 6, kind: output, shape index: {}]  }
   0x1 LB: > { %s2943_s22 = sadd.s32 4294967295, %s3641_s21   ;;  %p2947_p0 = scmp.ge.s32.totalorder %s3641_s21, 1  ;;  %s3641_s21 = sphi %s3680_s21, %s16_s21  }
   0x2   : > { %p213_p1 = scmp.lt.s32.totalorder %s3641_s21, 9 }
   0x4   : > { %p214_p2 = pnand %p2947_p0, %p213_p1 }
   0x5   : > { %s2948_s23 = sshll.u32 (!%p214_p2), %s2943_s22, 6  ;;  %v3643_v0 = vmov (!%p214_p2), 1   ;;  %v3644_v7 = vmov (!%p214_p2), 0   ;;  %v3582_v10 = vld [vmem:[%s4774_s2] sm:$0xff] (!%p214_p2)   ;;  %v3583_v13 = vld [vmem:[%s4774_s2 + $0x8] sm:$0xff] (!%p214_p2)   ;;  %v3584_v15 = vld [vmem:[%s4774_s2 + $0x10] sm:$0xff] (!%p214_p2)  }
   0x6   : > { %217 = sbr.rel (%p214_p2) target bundleno = 1285 (0x505), region = 44  ;;  %3516 = vset.pattern.permute.xlu0 (!%p214_p2), %v3643_v0  ;;  %3514 = vset.pattern.permute.xlu1 (!%p214_p2), %v3643_v0  ;;  %p244_p3 = scmp.lt.s32.totalorder (!%p214_p2), %s2948_s23, 511  ;;  %v3585_v17 = vld [vmem:[%s4774_s2 + $0x18] sm:$0xff] (!%p214_p2)   ;;  %v3586_v19 = vld [vmem:[%s4774_s2 + $0x20] sm:$0xff] (!%p214_p2)   ;;  %v3587_v20 = vld [vmem:[%s4774_s2 + $0x28] sm:$0xff] (!%p214_p2)   ;;  %vm1553_vm0 = vcmask (!%p214_p2), 15360  }
   0x7   : > { %3216 = vmatprep.subr.bf16.mxu0 (!%p214_p2), %v3582_v10  ;;  %v3588_v21 = vld [vmem:[%s4774_s2 + $0x30] sm:$0xff] (!%p214_p2)   ;;  %v3589_v23 = vld [vmem:[%s4774_s2 + $0x38] sm:$0xff] (!%p214_p2)  }
   0x8   : > { %3217 = vmatpush3.bf16.msra.mxu0 (!%p214_p2), %v3582_v10 }
   0x9   : > { %3218 = vmatprep.subr.bf16.mxu0 (!%p214_p2), %v3583_v13 }
   0xc   : > { %3219 = vmatpush3.bf16.msra.mxu0 (!%p214_p2), %v3583_v13 }
   0xd   : > { %s4780_s23 = smov (!%p244_p3, %s2948_s23), 511  ;;  %3220 = vmatprep.subr.bf16.mxu0 %v3584_v15 }
   0xe   : > { %s2949_s24 = sshll.u32 %s4780_s23, 3 }
   0xf   : > { %s3698_s27 = scalar_lea.vmem %s4772_s0, %s2949_s24  ;;  %s4535_s12 = scalar_lea.vmem %s4778_s6, %s2949_s24 }
  0x10   : > { %v264_v1 = vld [vmem:[%s3698_s27 + $0x10] sm:$0xff]  ;;  %v262_v2 = vld [vmem:[%s3698_s27] sm:$0xff]  ;;  %v263_v4 = vld [vmem:[%s3698_s27 + $0x8] sm:$0xff]  ;;  %3221 = vmatpush3.bf16.msra.mxu0 %v3584_v15 }
  0x11   : > { %499 = vperm.xlu0 %3516, %v264_v1   ;;  %491 = vperm.xlu1 %3514, %v262_v2   ;;  %v268_v3 = vld [vmem:[%s3698_s27 + $0x30] sm:$0xff]  ;;  %v265_v6 = vld [vmem:[%s3698_s27 + $0x18] sm:$0xff]  ;;  %v266_v11 = vld [vmem:[%s3698_s27 + $0x20] sm:$0xff] }
  0x12   : > { %v3705_v5 = vld [vmem:[%s3698_s27 + $0x50] sm:$0xff]  ;;  %v267_v16 = vld [vmem:[%s3698_s27 + $0x28] sm:$0xff]  ;;  %3222 = vmatprep.subr.bf16.mxu0 %v3585_v17  ;;  %v269_v18 = vld [vmem:[%s3698_s27 + $0x38] sm:$0xff] }
  0x13   : > { %v3711_v8 = vld [vmem:[%s3698_s27 + $0x70] sm:$0xff]  ;;  %v270_v22 = vld [vmem:[%s3698_s27 + $0x40] sm:$0xff]  ;;  %v271_v24 = vld [vmem:[%s3698_s27 + $0x48] sm:$0xff] }
  0x14   : > { %v3715_v9 = vld [vmem:[%s3698_s27 + $0x90] sm:$0xff]  ;;  %3223 = vmatpush3.bf16.msra.mxu0 %v3585_v17  ;;  %v275_v25 = vld [vmem:[%s3698_s27 + $0x68] sm:$0xff]  ;;  %v273_v26 = vld [vmem:[%s3698_s27 + $0x58] sm:$0xff] }
  0x15   : > { %515 = vperm.xlu0 %3516, %v268_v3   ;;  %495 = vperm.xlu1 %3514, %v263_v4   ;;  %v3723_v12 = vld [vmem:[%s3698_s27 + $0xb0] sm:$0xff]  ;;  %v279_v27 = vld [vmem:[%s3698_s27 + $0x88] sm:$0xff]  ;;  %v274_v28 = vld [vmem:[%s3698_s27 + $0x60] sm:$0xff] }
  0x16   : > { %v3731_v14 = vld [vmem:[%s3698_s27 + $0xd0] sm:$0xff]  ;;  %3224 = vmatprep.subr.bf16.mxu0 %v3586_v19  ;;  %v283_v29 = vld [vmem:[%s3698_s27 + $0xa8] sm:$0xff]  ;;  %v277_v31 = vld [vmem:[%s3698_s27 + $0x78] sm:$0xff] }
  0x17   : > { %v3777_v30 = vld [vmem:[%s3698_s27 + $0xc8] sm:$0xff]  ;;  %v278_v33 = vld [vmem:[%s3698_s27 + $0x80] sm:$0xff]  ;;  %v292_v34 = vld [vmem:[%s3698_s27 + $0xf0] sm:$0xff] }
  0x18   : > { %3225 = vmatpush3.bf16.msra.mxu0 %v3586_v19  ;;  %v3785_v32 = vld [vmem:[%s3698_s27 + $0xe8] sm:$0xff]  ;;  %v2984_v35 = vld [vmem:[%s3698_s27 + $0x110] sm:$0xff]  ;;  %v281_v36 = vld [vmem:[%s3698_s27 + $0x98] sm:$0xff] }
  0x19   : > { %531 = vperm.xlu0 %3516, %v3705_v5   ;;  %3515 = vset.pattern.permute.xlu1 %v3644_v7  ;;  %v2988_v37 = vld [vmem:[%s3698_s27 + $0x130] sm:$0xff]  ;;  %v282_v40 = vld [vmem:[%s3698_s27 + $0xa0] sm:$0xff]  ;;  %v285_v44 = vld [vmem:[%s3698_s27 + $0xb8] sm:$0xff] }
  0x1a   : > { %311 = vperm.xlu1 %3515, %v265_v6   ;;  %3226 = vmatprep.subr.bf16.mxu0 %v3587_v20  ;;  %v2992_v38 = vld [vmem:[%s3698_s27 + $0x150] sm:$0xff]  ;;  %v3821_v47 = vld [vmem:[%s3698_s27 + $0x108] sm:$0xff]  ;;  %v286_v53 = vld [vmem:[%s3698_s27 + $0xc0] sm:$0xff] }
  0x1b   : > { %v3800_v39 = vld [vmem:[%s3698_s27 + $0x170] sm:$0xff]  ;;  %v3831_v52 = vld [vmem:[%s3698_s27 + $0x128] sm:$0xff]  ;;  %v289_v60 = vld [vmem:[%s3698_s27 + $0xd8] sm:$0xff] }
  0x1c   : > { %3227 = vmatpush3.bf16.msra.mxu0 %v3587_v20  ;;  %v3806_v41 = vld [vmem:[%s3698_s27 + $0x190] sm:$0xff]  ;;  %v3842_v57 = vld [vmem:[%s3698_s27 + $0x148] sm:$0xff]  ;;  %v3881_v17 = vld [vmem:[%s4777_s5] ss:$0 sm:$0xff] }
  0x1d   : > { %547 = vperm.xlu0 %3516, %v3711_v8   ;;  %3228 = vmatprep.subr.bf16.mxu0 %v3588_v21  ;;  %v3811_v42 = vld [vmem:[%s3698_s27 + $0x1b0] sm:$0xff]  ;;  %v3853_v63 = vld [vmem:[%s3698_s27 + $0x168] sm:$0xff] }
  0x1e   : > { %3517 = vset.pattern.permute.xlu1 %v3643_v0  ;;  %v3815_v43 = vld [vmem:[%s3698_s27 + $0x1d0] sm:$0xff]  ;;  %v3873_v13 = vld [vmem:[%s3698_s27 + $0x188] sm:$0xff] }
  0x1f   : > { %503 = vperm.xlu1 %3517, %v265_v6  }
  0x20   : > { %3229 = vmatpush3.bf16.msra.mxu0 %v3588_v21 }
  0x21   : > { %563 = vperm.xlu0 %3516, %v3715_v9   ;;  %3230 = vmatprep.subr.bf16.mxu0 %v3589_v23 }
  0x23   : > { %3518 = vset.pattern.permute.xlu1 %v3644_v7 }
  0x24   : > { %316 = vperm.xlu1 %3518, %v266_v11   ;;  %3231 = vmatpush3.bf16.msra.mxu0 %v3589_v23 }
  0x25   : > { %579 = vperm.xlu0 %3516, %v3723_v12  }
  0x28   : > { %3519 = vset.pattern.permute.xlu1 %v3643_v0 }
  0x29   : > { %595 = vperm.xlu0 %3516, %v3731_v14   ;;  %507 = vperm.xlu1 %3519, %v266_v11  }
  0x2d   : > { %3541 = vset.pattern.permute.xlu0 %v3644_v7  ;;  %511 = vperm.xlu1 %3519, %v267_v16  }
  0x2e   : > { %296 = vperm.xlu0 %3541, %v262_v2  }
  0x31   : > { %3520 = vset.pattern.permute.xlu1 %v3644_v7 }
  0x32   : > { %301 = vperm.xlu0 %3541, %v263_v4   ;;  %331 = vperm.xlu1 %3520, %v269_v18  }
  0x36   : > { %306 = vperm.xlu0 %3541, %v264_v1   ;;  %3521 = vset.pattern.permute.xlu1 %v3643_v0  ;;  %v3858_v1 = vld [vmem:[%s4773_s1 + $0x1] ss:$0 sm:$0xff] }
  0x37   : > { %519 = vperm.xlu1 %3521, %v269_v18  }
  0x3a   : > { %321 = vperm.xlu0 %3541, %v267_v16  }
  0x3b   : > { %3522 = vset.pattern.permute.xlu1 %v3644_v7 }
  0x3c   : > { %336 = vperm.xlu1 %3522, %v270_v22  }
  0x3e   : > { %326 = vperm.xlu0 %3541, %v268_v3   ;;  %v3864_v3 = vld [vmem:[%s4773_s1] ss:$0 sm:$0xff] }
  0x40   : > { %3523 = vset.pattern.permute.xlu1 %v3643_v0 }
  0x41   : > { %523 = vperm.xlu1 %3523, %v270_v22  }
  0x42   : > { %341 = vperm.xlu0 %3541, %v271_v24  }
  0x45   : > { %527 = vperm.xlu1 %3523, %v271_v24  }
  0x46   : > { %346 = vperm.xlu0 %3541, %v3705_v5  }
  0x49   : > { %3524 = vset.pattern.permute.xlu1 %v3644_v7 }
  0x4a   : > { %361 = vperm.xlu0 %3541, %v275_v25   ;;  %351 = vperm.xlu1 %3524, %v273_v26  }
  0x4e   : > { %366 = vperm.xlu0 %3541, %v3711_v8   ;;  %3525 = vset.pattern.permute.xlu1 %v3643_v0 }
  0x4f   : > { %535 = vperm.xlu1 %3525, %v273_v26  }
  0x52   : > { %381 = vperm.xlu0 %3541, %v279_v27  }
  0x53   : > { %3526 = vset.pattern.permute.xlu1 %v3644_v7 }
  0x54   : > { %356 = vperm.xlu1 %3526, %v274_v28  }
  0x56   : > { %386 = vperm.xlu0 %3541, %v3715_v9  }
  0x58   : > { %3527 = vset.pattern.permute.xlu1 %v3643_v0 }
  0x59   : > { %539 = vperm.xlu1 %3527, %v274_v28  }
  0x5a   : > { %401 = vperm.xlu0 %3541, %v283_v29  }
  0x5d   : > { %543 = vperm.xlu1 %3527, %v275_v25  }
  0x5e   : > { %406 = vperm.xlu0 %3541, %v3723_v12  }
  0x61   : > { %3528 = vset.pattern.permute.xlu1 %v3644_v7 }
  0x62   : > { %421 = vperm.xlu0 %3541, %v3777_v30   ;;  %371 = vperm.xlu1 %3528, %v277_v31  }
  0x66   : > { %426 = vperm.xlu0 %3541, %v3731_v14   ;;  %3529 = vset.pattern.permute.xlu1 %v3643_v0  ;;  %v290_v14 = vld [vmem:[%s3698_s27 + $0xe0] sm:$0xff] }
  0x67   : > { %551 = vperm.xlu1 %3529, %v277_v31  }
  0x6a   : > { %441 = vperm.xlu0 %3541, %v3785_v32  }
  0x6b   : > { %3530 = vset.pattern.permute.xlu1 %v3644_v7 }
  0x6c   : > { %376 = vperm.xlu1 %3530, %v278_v33  }
  0x6e   : > { %446 = vperm.xlu0 %3541, %v292_v34  }
  0x70   : > { %3531 = vset.pattern.permute.xlu1 %v3643_v0 }
  0x71   : > { %555 = vperm.xlu1 %3531, %v278_v33  }
  0x72   : > { %3546 = vset.pattern.permute.xlu0 %v3643_v0 }
  0x73   : > { %611 = vperm.xlu0 %3546, %v292_v34  }
  0x75   : > { %559 = vperm.xlu1 %3531, %v279_v27  }
  0x77   : > { %1820 = vperm.xlu0 %3546, %v2984_v35  }
  0x79   : > { %3532 = vset.pattern.permute.xlu1 %v3644_v7 }
  0x7a   : > { %391 = vperm.xlu1 %3532, %v281_v36  }
  0x7b   : > { %1836 = vperm.xlu0 %3546, %v2988_v37  }
  0x7e   : > { %3533 = vset.pattern.permute.xlu1 %v3643_v0 }
  0x7f   : > { %1852 = vperm.xlu0 %3546, %v2992_v38   ;;  %567 = vperm.xlu1 %3533, %v281_v36  }
  0x83   : > { %1868 = vperm.xlu0 %3546, %v3800_v39   ;;  %3534 = vset.pattern.permute.xlu1 %v3644_v7 }
  0x84   : > { %396 = vperm.xlu1 %3534, %v282_v40  }
  0x87   : > { %1884 = vperm.xlu0 %3546, %v3806_v41  }
  0x88   : > { %3535 = vset.pattern.permute.xlu1 %v3643_v0 }
  0x89   : > { %571 = vperm.xlu1 %3535, %v282_v40  }
  0x8b   : > { %1900 = vperm.xlu0 %3546, %v3811_v42  }
  0x8d   : > { %575 = vperm.xlu1 %3535, %v283_v29  }
  0x8f   : > { %1916 = vperm.xlu0 %3546, %v3815_v43  }
  0x90   : > { %v492_v45 = vpop.permute.xlu1 %491  ;;  %v500_v46 = vpop.permute.xlu0 %499 }
  0x91   : > { %3536 = vset.pattern.permute.xlu1 %v3644_v7  ;;  %v622_v5 = vmul.f32 %v3858_v1, %v492_v45  ;;  %v624_v20 = vmul.f32 %v3858_v1, %v500_v46 }
  0x92   : > { %411 = vperm.xlu1 %3536, %v285_v44  }
  0x93   : > { %3575 = vset.pattern.permute.xlu0 %v3644_v7 }
  0x94   : > { %1626 = vperm.xlu0 %3575, %v3821_v47   ;;  %v496_v48 = vpop.permute.xlu1 %495  ;;  %v3825_v49 = vpop.permute.xlu0 %515 }
  0x95   : > { %v623_v15 = vmul.f32 %v3858_v1, %v496_v48 }
  0x96   : > { %3537 = vset.pattern.permute.xlu1 %v3643_v0 }
  0x97   : > { %583 = vperm.xlu1 %3537, %v285_v44  }
  0x98   : > { %1631 = vperm.xlu0 %3575, %v2984_v35   ;;  %v3828_v50 = vpop.permute.xlu0 %531 }
  0x99   : > { %v312_v51 = vpop.permute.xlu1 %311 }
  0x9a   : > { %v461_v10 = vmul.f32 %v3864_v3, %v312_v51 }
  0x9b   : > { %3538 = vset.pattern.permute.xlu1 %v3644_v7 }
  0x9c   : > { %1646 = vperm.xlu0 %3575, %v3831_v52   ;;  %416 = vperm.xlu1 %3538, %v286_v53   ;;  %v3836_v54 = vpop.permute.xlu0 %547 }
  0x9e   : > { %v504_v55 = vpop.permute.xlu1 %503 }
  0x9f   : > { %v625_v8 = vmul.f32 %v3858_v1, %v504_v55 }
  0xa0   : > { %1651 = vperm.xlu0 %3575, %v2988_v37   ;;  %3539 = vset.pattern.permute.xlu1 %v3643_v0  ;;  %v3839_v56 = vpop.permute.xlu0 %563  ;;  %v3897_v37 = vld [vmem:[%s3698_s27 + $0x1a8] sm:$0xff] }
  0xa1   : > { %587 = vperm.xlu1 %3539, %v286_v53   ;;  %v657_v18 = vadd.f32 %v625_v8, %v461_v10 }
  0xa3   : > { %v317_v58 = vpop.permute.xlu1 %316  ;;  %v693_v28 = vadd.f32 %v3881_v17, %v657_v18 }
  0xa4   : > { %1666 = vperm.xlu0 %3575, %v3842_v57   ;;  %v3845_v59 = vpop.permute.xlu0 %579  ;;  %v462_v23 = vmul.f32 %v3864_v3, %v317_v58 }
  0xa5   : > { %591 = vperm.xlu1 %3539, %v3777_v30   ;;  %v725_v46 = vmax.f32 %v693_v28, 0.0 }
  0xa8   : > { %1671 = vperm.xlu0 %3575, %v2992_v38   ;;  %v508_v61 = vpop.permute.xlu1 %507  ;;  %v3849_v62 = vpop.permute.xlu0 %595 }
  0xa9   : > { %3540 = vset.pattern.permute.xlu1 %v3644_v7  ;;  %v626_v19 = vmul.f32 %v3858_v1, %v508_v61 }
  0xaa   : > { %431 = vperm.xlu1 %3540, %v289_v60  }
  0xab   : > { %v658_v29 = vadd.f32 %v626_v19, %v462_v23 }
  0xac   : > { %1686 = vperm.xlu0 %3575, %v3853_v63   ;;  %v512_v2 = vpop.permute.xlu1 %511 }
  0xad   : > { %v297_v4 = vpop.permute.xlu0 %296  ;;  %v627_v35 = vmul.f32 %v3858_v1, %v512_v2  ;;  %v694_v48 = vadd.f32 %v3881_v17, %v658_v29 }
  0xae   : > { %v458_v6 = vmul.f32 %v3864_v3, %v297_v4  ;;  %3542 = vset.pattern.permute.xlu1 %v3643_v0 }
  0xaf   : > { %599 = vperm.xlu1 %3542, %v289_v60  }
  0xb0   : > { %v654_v9 = vadd.f32 %v622_v5, %v458_v6  ;;  %1691 = vperm.xlu0 %3575, %v3800_v39  }
  0xb1   : > { %v302_v11 = vpop.permute.xlu0 %301  ;;  %v332_v12 = vpop.permute.xlu1 %331 }
  0xb2   : > { %v459_v16 = vmul.f32 %v3864_v3, %v302_v11  ;;  %v690_v22 = vadd.f32 %v3881_v17, %v654_v9  ;;  %v465_v38 = vmul.f32 %v3864_v3, %v332_v12  ;;  %v726_v9 = vmax.f32 %v694_v48, 0.0  ;;  %v3916_v12 = vld [vmem:[%s3698_s27 + $0x1c8] sm:$0xff]  ;;  %v2985_v48 = vld [vmem:[%s3698_s27 + $0x118] sm:$0xff] }
  0xb3   : > { %3543 = vset.pattern.permute.xlu1 %v3644_v7 }
  0xb4   : > { %v655_v21 = vadd.f32 %v623_v15, %v459_v16  ;;  %1706 = vperm.xlu0 %3575, %v3873_v13   ;;  %436 = vperm.xlu1 %3543, %v290_v14   ;;  %v722_v33 = vmax.f32 %v690_v22, 0.0 }
  0xb5   : > { %v307_v24 = vpop.permute.xlu0 %306 }
  0xb6   : > { %v460_v25 = vmul.f32 %v3864_v3, %v307_v24  ;;  %v520_v26 = vpop.permute.xlu1 %519  ;;  %v691_v27 = vadd.f32 %v3881_v17, %v655_v21  ;;  %v632_v24 = vmul.f32 %v3858_v1, %v3828_v50 }
  0xb7   : > { %v629_v31 = vmul.f32 %v3858_v1, %v520_v26 }
  0xb8   : > { %v656_v30 = vadd.f32 %v624_v20, %v460_v25  ;;  %1711 = vperm.xlu0 %3575, %v3806_v41   ;;  %3544 = vset.pattern.permute.xlu1 %v3643_v0  ;;  %v723_v34 = vmax.f32 %v691_v27, 0.0  ;;  %v628_v41 = vmul.f32 %v3858_v1, %v3825_v49  ;;  %v293_v49 = vld [vmem:[%s3698_s27 + $0xf8] sm:$0xff] }
  0xb9   : > { %v322_v36 = vpop.permute.xlu0 %321  ;;  %603 = vperm.xlu1 %3544, %v290_v14   ;;  %v661_v53 = vadd.f32 %v629_v31, %v465_v38 }
  0xba   : > { %v692_v39 = vadd.f32 %v3881_v17, %v656_v30  ;;  %v463_v40 = vmul.f32 %v3864_v3, %v322_v36  ;;  %v754_v44 = vpack.c.bf16 %v723_v34, %v722_v33  ;;  %v2982_v30 = vld [vmem:[%s3698_s27 + $0x100] sm:$0xff] }
  0xbb   : > { %v337_v45 = vpop.permute.xlu1 %336  ;;  %v697_v4 = vadd.f32 %v3881_v17, %v661_v53 }
  0xbc   : > { %v724_v51 = vmax.f32 %v692_v39, 0.0  ;;  %v659_v55 = vadd.f32 %v627_v35, %v463_v40  ;;  %1726 = vperm.xlu0 %3575, %v3897_v37   ;;  %3232 = vmatprep.mubr.bf16.mxu0 %v754_v44  ;;  %v466_v10 = vmul.f32 %v3864_v3, %v337_v45 }
  0xbd   : > { %v327_v58 = vpop.permute.xlu0 %326  ;;  %607 = vperm.xlu1 %3544, %v3785_v32   ;;  %v729_v20 = vmax.f32 %v697_v4, 0.0 }
  0xbe   : > { %v695_v60 = vadd.f32 %v3881_v17, %v659_v55  ;;  %v464_v61 = vmul.f32 %v3864_v3, %v327_v58  ;;  %v755_v2 = vpack.c.bf16 %v725_v46, %v724_v51 }
  0xc0   : > { %v727_v5 = vmax.f32 %v695_v60, 0.0  ;;  %v660_v6 = vadd.f32 %v628_v41, %v464_v61  ;;  %1731 = vperm.xlu0 %3575, %v3811_v42   ;;  %3233 = vmatmul.mubr.bf16.vlgmr.msra.gmra.mrb[0].mxu0 %v755_v2  ;;  %v524_v8 = vpop.permute.xlu1 %523 }
  0xc1   : > { %v630_v32 = vmul.f32 %v3858_v1, %v524_v8  ;;  %v342_v11 = vpop.permute.xlu0 %341  ;;  %3545 = vset.pattern.permute.xlu1 %v3644_v7 }
  0xc2   : > { %v696_v14 = vadd.f32 %v3881_v17, %v660_v6  ;;  %451 = vperm.xlu1 %3545, %v293_v49   ;;  %v756_v15 = vpack.c.bf16 %v727_v5, %v726_v9  ;;  %v467_v18 = vmul.f32 %v3864_v3, %v342_v11  ;;  %v636_v6 = vmul.f32 %v3858_v1, %v3836_v54 }
  0xc3   : > { %v662_v16 = vadd.f32 %v630_v32, %v466_v10  ;;  %v2986_v32 = vld [vmem:[%s3698_s27 + $0x120] sm:$0xff] }
  0xc4   : > { %v728_v42 = vmax.f32 %v696_v14, 0.0  ;;  %1746 = vperm.xlu0 %3575, %v3916_v12   ;;  %3236 = vmatprep.mubr.bf16.mxu0 %v756_v15  ;;  %v528_v19 = vpop.permute.xlu1 %527 }
  0xc5   : > { %v631_v21 = vmul.f32 %v3858_v1, %v528_v19  ;;  %v347_v22 = vpop.permute.xlu0 %346  ;;  %v698_v25 = vadd.f32 %v3881_v17, %v662_v16 }
  0xc6   : > { %3547 = vset.pattern.permute.xlu1 %v3643_v0  ;;  %v757_v23 = vpack.c.bf16 %v729_v20, %v728_v42  ;;  %v468_v27 = vmul.f32 %v3864_v3, %v347_v22 }
  0xc7   : > { %v663_v26 = vadd.f32 %v631_v21, %v467_v18  ;;  %615 = vperm.xlu1 %3547, %v293_v49   ;;  %v730_v33 = vmax.f32 %v698_v25, 0.0 }
  0xc8   : > { %1751 = vperm.xlu0 %3575, %v3815_v43   ;;  %3237 = vmatmul.mubr.bf16.gmra.mrb[4].mxu0 %v757_v23  ;;  %v664_v31 = vadd.f32 %v632_v24, %v468_v27 }
  0xc9   : > { %v699_v28 = vadd.f32 %v3881_v17, %v663_v26  ;;  %v352_v29 = vpop.permute.xlu1 %351  ;;  %v362_v58 = vpop.permute.xlu0 %361  ;;  %v2989_v26 = vld [vmem:[%s3698_s27 + $0x138] sm:$0xff] }
  0xca   : > { %v700_v36 = vadd.f32 %v3881_v17, %v664_v31  ;;  %v469_v38 = vmul.f32 %v3864_v3, %v352_v29  ;;  %v471_v60 = vmul.f32 %v3864_v3, %v362_v58 }
  0xcb   : > { %3548 = vset.pattern.permute.xlu1 %v3644_v7  ;;  %v731_v34 = vmax.f32 %v699_v28, 0.0 }
  0xcc   : > { %1621 = vperm.xlu1 %3548, %v2982_v30   ;;  %v732_v40 = vmax.f32 %v700_v36, 0.0 }
  0xcd   : > { %v758_v50 = vpack.c.bf16 %v731_v34, %v730_v33  ;;  %v367_v5 = vpop.permute.xlu0 %366 }
  0xce   : > { %v536_v35 = vpop.permute.xlu1 %535  ;;  %v472_v8 = vmul.f32 %v3864_v3, %v367_v5 }
  0xcf   : > { %v633_v43 = vmul.f32 %v3858_v1, %v536_v35  ;;  %3240 = vmatprep.mubr.bf16.mxu0 %v758_v50 }
  0xd0   : > { %3549 = vset.pattern.permute.xlu1 %v3643_v0  ;;  %v668_v15 = vadd.f32 %v636_v6, %v472_v8 }
  0xd1   : > { %v665_v39 = vadd.f32 %v633_v43, %v469_v38  ;;  %1812 = vperm.xlu1 %3549, %v2982_v30   ;;  %v382_v30 = vpop.permute.xlu0 %381  ;;  %v640_v38 = vmul.f32 %v3858_v1, %v3839_v56  ;;  %v3591_v56 = vld [vmem:[%s4775_s3 + $0x8] sm:$0xff]  }
  0xd2   : > { %v704_v54 = vadd.f32 %v3881_v17, %v668_v15  ;;  %v475_v31 = vmul.f32 %v3864_v3, %v382_v30 }
  0xd3   : > { %v701_v44 = vadd.f32 %v3881_v17, %v665_v39  ;;  %v357_v41 = vpop.permute.xlu1 %356 }
  0xd4   : > { %v470_v53 = vmul.f32 %v3864_v3, %v357_v41  ;;  %v736_v23 = vmax.f32 %v704_v54, 0.0 }
  0xd5   : > { %1816 = vperm.xlu1 %3549, %v3821_v47   ;;  %v733_v45 = vmax.f32 %v701_v44, 0.0  ;;  %v387_v36 = vpop.permute.xlu0 %386  ;;  %v2990_v44 = vld [vmem:[%s3698_s27 + $0x140] sm:$0xff] }
  0xd6   : > { %v476_v43 = vmul.f32 %v3864_v3, %v387_v36  ;;  %v3597_v36 = vld [vmem:[%s4775_s3 + $0x38] sm:$0xff]  }
  0xd7   : > { %v759_v46 = vpack.c.bf16 %v733_v45, %v732_v40 }
  0xd8   : > { %v540_v51 = vpop.permute.xlu1 %539 }
  0xd9   : > { %v634_v55 = vmul.f32 %v3858_v1, %v540_v51  ;;  %3550 = vset.pattern.permute.xlu1 %v3644_v7  ;;  %3241 = vmatmul.mubr.bf16.gmra.mrb[8].mxu0 %v759_v46  ;;  %v3590_v46 = vld [vmem:[%s4775_s3] sm:$0xff]  }
  0xda   : > { %1636 = vperm.xlu1 %3550, %v2985_v48   ;;  %3264 = vmatprep.subr.bf16.mxu1 %v3590_v46 }
  0xdb   : > { %v666_v61 = vadd.f32 %v634_v55, %v470_v53  ;;  %3265 = vmatpush3.bf16.msra.mxu1 %v3590_v46 }
  0xdc   : > { %v544_v2 = vpop.permute.xlu1 %543  ;;  %3266 = vmatprep.subr.bf16.mxu1 %v3591_v56 }
  0xdd   : > { %v635_v47 = vmul.f32 %v3858_v1, %v544_v2  ;;  %v702_v49 = vadd.f32 %v3881_v17, %v666_v61 }
  0xde   : > { %3551 = vset.pattern.permute.xlu1 %v3643_v0 }
  0xdf   : > { %v667_v4 = vadd.f32 %v635_v47, %v471_v60  ;;  %1824 = vperm.xlu1 %3551, %v2985_v48   ;;  %v734_v11 = vmax.f32 %v702_v49, 0.0  ;;  %v672_v48 = vadd.f32 %v640_v38, %v476_v43  ;;  %v402_v60 = vpop.permute.xlu0 %401  ;;  %3267 = vmatpush3.bf16.msra.mxu1 %v3591_v56  ;;  %v2997_v56 = vld [vmem:[%s3698_s27 + $0x178] sm:$0xff] }
  0xe1   : > { %v703_v9 = vadd.f32 %v3881_v17, %v667_v4  ;;  %v372_v10 = vpop.permute.xlu1 %371  ;;  %v708_v61 = vadd.f32 %v3881_v17, %v672_v48  ;;  %v3592_v4 = vld [vmem:[%s4775_s3 + $0x10] sm:$0xff]  }
  0xe2   : > { %v473_v42 = vmul.f32 %v3864_v3, %v372_v10  ;;  %3268 = vmatprep.subr.bf16.mxu1 %v3592_v4  ;;  %v2993_v10 = vld [vmem:[%s3698_s27 + $0x158] sm:$0xff]  ;;  %v3012_v48 = vld [vmem:[%s3698_s27 + $0x1f0] sm:$0xff] }
  0xe3   : > { %3552 = vset.pattern.permute.xlu1 %v3644_v7  ;;  %v735_v14 = vmax.f32 %v703_v9, 0.0  ;;  %v740_v5 = vmax.f32 %v708_v61, 0.0  ;;  %v407_v8 = vpop.permute.xlu0 %406  ;;  %3269 = vmatpush3.bf16.msra.mxu1 %v3592_v4 }
  0xe4   : > { %1641 = vperm.xlu1 %3552, %v2986_v32  }
  0xe5   : > { %v760_v16 = vpack.c.bf16 %v735_v14, %v734_v11  ;;  %v3593_v11 = vld [vmem:[%s4775_s3 + $0x18] sm:$0xff]  }
  0xe6   : > { %v552_v18 = vpop.permute.xlu1 %551  ;;  %3270 = vmatprep.subr.bf16.mxu1 %v3593_v11 }
  0xe7   : > { %v637_v19 = vmul.f32 %v3858_v1, %v552_v18  ;;  %3244 = vmatprep.mubr.bf16.mxu0 %v760_v16  ;;  %3271 = vmatpush3.bf16.msra.mxu1 %v3593_v11  ;;  %v3594_v16 = vld [vmem:[%s4775_s3 + $0x20] sm:$0xff]   ;;  %v3996_v18 = vpop.permute.xlu0 %421 }
  0xe8   : > { %3553 = vset.pattern.permute.xlu1 %v3643_v0  ;;  %3272 = vmatprep.subr.bf16.mxu1 %v3594_v16 }
  0xe9   : > { %v669_v20 = vadd.f32 %v637_v19, %v473_v42  ;;  %1828 = vperm.xlu1 %3553, %v2986_v32   ;;  %v479_v19 = vmul.f32 %v3864_v3, %v402_v60 }
  0xeb   : > { %v705_v21 = vadd.f32 %v3881_v17, %v669_v20  ;;  %v377_v22 = vpop.permute.xlu1 %376  ;;  %3273 = vmatpush3.bf16.msra.mxu1 %v3594_v16 }
  0xec   : > { %v474_v28 = vmul.f32 %v3864_v3, %v377_v22  ;;  %v3595_v22 = vld [vmem:[%s4775_s3 + $0x28] sm:$0xff]  }
  0xed   : > { %1832 = vperm.xlu1 %3553, %v3831_v52   ;;  %v737_v24 = vmax.f32 %v705_v21, 0.0  ;;  %3274 = vmatprep.subr.bf16.mxu1 %v3595_v22 }
  0xef   : > { %v761_v25 = vpack.c.bf16 %v737_v24, %v736_v23  ;;  %v644_v23 = vmul.f32 %v3858_v1, %v3845_v59  ;;  %v480_v24 = vmul.f32 %v3864_v3, %v407_v8  ;;  %3275 = vmatpush3.bf16.msra.mxu1 %v3595_v22 }
  0xf0   : > { %v556_v27 = vpop.permute.xlu1 %555 }
  0xf1   : > { %v638_v29 = vmul.f32 %v3858_v1, %v556_v27  ;;  %3554 = vset.pattern.permute.xlu1 %v3644_v7  ;;  %3245 = vmatmul.mubr.bf16.gmra.mrb[12].mxu0 %v761_v25  ;;  %v2994_v27 = vld [vmem:[%s3698_s27 + $0x160] sm:$0xff]  ;;  %v676_v59 = vadd.f32 %v644_v23, %v480_v24 }
  0xf2   : > { %1656 = vperm.xlu1 %3554, %v2989_v26  }
  0xf3   : > { %v670_v33 = vadd.f32 %v638_v29, %v474_v28  ;;  %v427_v28 = vpop.permute.xlu0 %426  ;;  %v712_v38 = vadd.f32 %v3881_v17, %v676_v59 }
  0xf4   : > { %v560_v34 = vpop.permute.xlu1 %559  ;;  %v484_v8 = vmul.f32 %v3864_v3, %v427_v28 }
  0xf5   : > { %v639_v52 = vmul.f32 %v3858_v1, %v560_v34  ;;  %v706_v50 = vadd.f32 %v3881_v17, %v670_v33 }
  0xf6   : > { %3555 = vset.pattern.permute.xlu1 %v3643_v0 }
  0xf7   : > { %v671_v35 = vadd.f32 %v639_v52, %v475_v31  ;;  %1840 = vperm.xlu1 %3555, %v2989_v26   ;;  %v738_v41 = vmax.f32 %v706_v50, 0.0  ;;  %v3596_v31 = vld [vmem:[%s4775_s3 + $0x30] sm:$0xff]   ;;  %v4014_v34 = vpop.permute.xlu0 %441 }
  0xf8   : > { %3276 = vmatprep.subr.bf16.mxu1 %v3596_v31 }
  0xf9   : > { %v707_v39 = vadd.f32 %v3881_v17, %v671_v35  ;;  %v392_v40 = vpop.permute.xlu1 %391  ;;  %3277 = vmatpush3.bf16.msra.mxu1 %v3596_v31 }
  0xfa   : > { %v477_v55 = vmul.f32 %v3864_v3, %v392_v40  ;;  %3278 = vmatprep.subr.bf16.mxu1 %v3597_v36 }
  0xfb   : > { %3556 = vset.pattern.permute.xlu1 %v3644_v7  ;;  %v739_v45 = vmax.f32 %v707_v39, 0.0  ;;  %v4024_v39 = vld [vmem:[%s3698_s27 + $0x1e8] sm:$0xff] }
  0xfc   : > { %1661 = vperm.xlu1 %3556, %v2990_v44   ;;  %1766 = vperm.xlu0 %3575, %v4024_v39  }
  0xfd   : > { %v762_v51 = vpack.c.bf16 %v739_v45, %v738_v41  ;;  %3279 = vmatpush3.bf16.msra.mxu1 %v3597_v36  ;;  %v4028_v41 = vpop.permute.xlu0 %446  ;;  %v744_v45 = vmax.f32 %v712_v38, 0.0 }
  0xfe   : > { %v568_v53 = vpop.permute.xlu1 %567  ;;  %v488_v36 = vmul.f32 %v3864_v3, %v4028_v41 }
  0xff   : > { %v641_v58 = vmul.f32 %v3858_v1, %v568_v53  ;;  %3248 = vmatprep.mubr.bf16.mxu0 %v762_v51 }
 0x100   : > { %3557 = vset.pattern.permute.xlu1 %v3643_v0  ;;  %1771 = vperm.xlu0 %3575, %v3012_v48  }
 0x101   : > { %v673_v2 = vadd.f32 %v641_v58, %v477_v55  ;;  %1844 = vperm.xlu1 %3557, %v2990_v44   ;;  %v612_v60 = vpop.permute.xlu0 %611 }
 0x102   : > { %v652_v38 = vmul.f32 %v3858_v1, %v612_v60 }
 0x103   : > { %v709_v47 = vadd.f32 %v3881_v17, %v673_v2  ;;  %v397_v49 = vpop.permute.xlu1 %396  ;;  %v483_v2 = vmul.f32 %v3864_v3, %v3996_v18 }
 0x104   : > { %v478_v14 = vmul.f32 %v3864_v3, %v397_v49  ;;  %3580 = vset.pattern.permute.xlu0 %v3643_v0 }
 0x105   : > { %1848 = vperm.xlu1 %3557, %v3842_v57   ;;  %v741_v6 = vmax.f32 %v709_v47, 0.0  ;;  %1932 = vperm.xlu0 %3580, %v3012_v48  }
 0x107   : > { %v763_v9 = vpack.c.bf16 %v741_v6, %v740_v5  ;;  %v4042_v5 = vpop.permute.xlu0 %1820  ;;  %v648_v6 = vmul.f32 %v3858_v1, %v3849_v62 }
 0x108   : > { %v572_v32 = vpop.permute.xlu1 %571 }
 0x109   : > { %v642_v15 = vmul.f32 %v3858_v1, %v572_v32  ;;  %3558 = vset.pattern.permute.xlu1 %v3644_v7  ;;  %3249 = vmatmul.mubr.bf16.gmra.mrb[16].mxu0 %v763_v9  ;;  %v2998_v32 = vld [vmem:[%s3698_s27 + $0x180] sm:$0xff] }
 0x10a   : > { %1676 = vperm.xlu1 %3558, %v2993_v10  }
 0x10b   : > { %v674_v57 = vadd.f32 %v642_v15, %v478_v14  ;;  %v680_v15 = vadd.f32 %v648_v6, %v484_v8  ;;  %v4050_v16 = vpop.permute.xlu0 %1836  ;;  %v3005_v6 = vld [vmem:[%s3698_s27 + $0x1b8] sm:$0xff] }
 0x10c   : > { %v576_v42 = vpop.permute.xlu1 %575 }
 0x10d   : > { %v643_v54 = vmul.f32 %v3858_v1, %v576_v42  ;;  %v710_v20 = vadd.f32 %v3881_v17, %v674_v57 }
 0x10e   : > { %3559 = vset.pattern.permute.xlu1 %v3643_v0 }
 0x10f   : > { %v675_v21 = vadd.f32 %v643_v54, %v479_v19  ;;  %1856 = vperm.xlu1 %3559, %v2993_v10   ;;  %v742_v29 = vmax.f32 %v710_v20, 0.0  ;;  %v716_v19 = vadd.f32 %v3881_v17, %v680_v15  ;;  %v4057_v22 = vpop.permute.xlu0 %1852 }
 0x111   : > { %v711_v25 = vadd.f32 %v3881_v17, %v675_v21  ;;  %v412_v26 = vpop.permute.xlu1 %411  ;;  %v748_v23 = vmax.f32 %v716_v19, 0.0  ;;  %v3006_v19 = vld [vmem:[%s3698_s27 + $0x1c0] sm:$0xff] }
 0x112   : > { %v481_v50 = vmul.f32 %v3864_v3, %v412_v26  ;;  %v3001_v26 = vld [vmem:[%s3698_s27 + $0x198] sm:$0xff] }
 0x113   : > { %3560 = vset.pattern.permute.xlu1 %v3644_v7  ;;  %v743_v30 = vmax.f32 %v711_v25, 0.0 }
 0x114   : > { %1681 = vperm.xlu1 %3560, %v2994_v27  }
 0x115   : > { %v764_v33 = vpack.c.bf16 %v743_v30, %v742_v29  ;;  %v4064_v30 = vpop.permute.xlu0 %1868 }
 0x116   : > { %v584_v52 = vpop.permute.xlu1 %583 }
 0x117   : > { %v645_v35 = vmul.f32 %v3858_v1, %v584_v52  ;;  %3252 = vmatprep.mubr.bf16.mxu0 %v764_v33  ;;  %v487_v33 = vmul.f32 %v3864_v3, %v4014_v34 }
 0x118   : > { %3561 = vset.pattern.permute.xlu1 %v3643_v0 }
 0x119   : > { %v677_v43 = vadd.f32 %v645_v35, %v481_v50  ;;  %1860 = vperm.xlu1 %3561, %v2994_v27   ;;  %v4071_v35 = vpop.permute.xlu0 %1884 }
 0x11b   : > { %v713_v40 = vadd.f32 %v3881_v17, %v677_v43  ;;  %v417_v44 = vpop.permute.xlu1 %416 }
 0x11c   : > { %v482_v55 = vmul.f32 %v3864_v3, %v417_v44  ;;  %v3002_v44 = vld [vmem:[%s3698_s27 + $0x1a0] sm:$0xff] }
 0x11d   : > { %1864 = vperm.xlu1 %3561, %v3853_v63   ;;  %v745_v46 = vmax.f32 %v713_v40, 0.0 }
 0x11f   : > { %v765_v51 = vpack.c.bf16 %v745_v46, %v744_v45  ;;  %v684_v46 = vadd.f32 %v652_v38, %v488_v36 }
 0x120   : > { %v588_v53 = vpop.permute.xlu1 %587 }
 0x121   : > { %v646_v58 = vmul.f32 %v3858_v1, %v588_v53  ;;  %3562 = vset.pattern.permute.xlu1 %v3644_v7  ;;  %3253 = vmatmul.mubr.bf16.gmra.mrb[20].mxu0 %v765_v51  ;;  %v4079_v51 = vpop.permute.xlu0 %1900 }
 0x122   : > { %1696 = vperm.xlu1 %3562, %v2997_v56  }
 0x123   : > { %v678_v61 = vadd.f32 %v646_v58, %v482_v55  ;;  %v720_v55 = vadd.f32 %v3881_v17, %v684_v46 }
 0x124   : > { %v592_v63 = vpop.permute.xlu1 %591 }
 0x125   : > { %v647_v47 = vmul.f32 %v3858_v1, %v592_v63  ;;  %v714_v49 = vadd.f32 %v3881_v17, %v678_v61  ;;  %v4086_v63 = vpop.permute.xlu0 %1916 }
 0x126   : > { %3563 = vset.pattern.permute.xlu1 %v3643_v0 }
 0x127   : > { %v679_v4 = vadd.f32 %v647_v47, %v483_v2  ;;  %1872 = vperm.xlu1 %3563, %v2997_v56   ;;  %v746_v11 = vmax.f32 %v714_v49, 0.0  ;;  %v752_v2 = vmax.f32 %v720_v55, 0.0  ;;  %v3598_v55 = vld [vmem:[%s4774_s2] sm:$0xff]  }
 0x128   : > { %3360 = vmatprep.subr.bf16.mxu1 %v3598_v55 }
 0x129   : > { %v715_v9 = vadd.f32 %v3881_v17, %v679_v4  ;;  %v432_v10 = vpop.permute.xlu1 %431 }
 0x12a   : > { %v485_v42 = vmul.f32 %v3864_v3, %v432_v10  ;;  %v1627_v10 = vpop.permute.xlu0 %1626 }
 0x12b   : > { %v747_v14 = vmax.f32 %v715_v9, 0.0  ;;  %3564 = vset.pattern.permute.xlu1 %v3644_v7 }
 0x12c   : > { %1701 = vperm.xlu1 %3564, %v2998_v32  }
 0x12d   : > { %v766_v57 = vpack.c.bf16 %v747_v14, %v746_v11 }
 0x12e   : > { %v600_v18 = vpop.permute.xlu1 %599 }
 0x12f   : > { %v649_v62 = vmul.f32 %v3858_v1, %v600_v18  ;;  %3256 = vmatprep.mubr.bf16.mxu0 %v766_v57 }
 0x130   : > { %3565 = vset.pattern.permute.xlu1 %v3643_v0 }
 0x131   : > { %v681_v54 = vadd.f32 %v649_v62, %v485_v42  ;;  %1876 = vperm.xlu1 %3565, %v2998_v32   ;;  %v1780_v32 = vmul.f32 %v3864_v3, %v1627_v10 }
 0x133   : > { %v717_v20 = vadd.f32 %v3881_v17, %v681_v54  ;;  %v437_v21 = vpop.permute.xlu1 %436 }
 0x134   : > { %v486_v28 = vmul.f32 %v3864_v3, %v437_v21 }
 0x135   : > { %v749_v24 = vmax.f32 %v717_v20, 0.0  ;;  %1880 = vperm.xlu1 %3565, %v3873_v13  }
 0x137   : > { %v767_v25 = vpack.c.bf16 %v749_v24, %v748_v23 }
 0x138   : > { %v604_v27 = vpop.permute.xlu1 %603 }
 0x139   : > { %v650_v29 = vmul.f32 %v3858_v1, %v604_v27  ;;  %3566 = vset.pattern.permute.xlu1 %v3644_v7  ;;  %3257 = vmatmul.mubr.bf16.gmra.mrb[24].mxu0 %v767_v25  ;;  %v4107_v27 = vpop.permute.xlu0 %1631 }
 0x13a   : > { %1716 = vperm.xlu1 %3566, %v3001_v26  }
 0x13b   : > { %v682_v31 = vadd.f32 %v650_v29, %v486_v28  ;;  %v3009_v29 = vld [vmem:[%s3698_s27 + $0x1d8] sm:$0xff] }
 0x13c   : > { %v608_v59 = vpop.permute.xlu1 %607 }
 0x13d   : > { %v651_v13 = vmul.f32 %v3858_v1, %v608_v59  ;;  %v718_v52 = vadd.f32 %v3881_v17, %v682_v31 }
 0x13e   : > { %3567 = vset.pattern.permute.xlu1 %v3643_v0 }
 0x13f   : > { %v683_v50 = vadd.f32 %v651_v13, %v487_v33  ;;  %1888 = vperm.xlu1 %3567, %v3001_v26   ;;  %v750_v34 = vmax.f32 %v718_v52, 0.0  ;;  %v1647_v33 = vpop.permute.xlu0 %1646 }
 0x140   : > { %v1784_v13 = vmul.f32 %v3864_v3, %v1647_v33 }
 0x141   : > { %v719_v43 = vadd.f32 %v3881_v17, %v683_v50  ;;  %v452_v40 = vpop.permute.xlu1 %451 }
 0x142   : > { %v489_v53 = vmul.f32 %v3864_v3, %v452_v40 }
 0x143   : > { %v751_v45 = vmax.f32 %v719_v43, 0.0  ;;  %3568 = vset.pattern.permute.xlu1 %v3644_v7 }
 0x144   : > { %1721 = vperm.xlu1 %3568, %v3002_v44  }
 0x145   : > { %v768_v48 = vpack.c.bf16 %v751_v45, %v750_v34  ;;  %v3010_v34 = vld [vmem:[%s3698_s27 + $0x1e0] sm:$0xff] }
 0x146   : > { %v616_v56 = vpop.permute.xlu1 %615 }
 0x147   : > { %v653_v41 = vmul.f32 %v3858_v1, %v616_v56  ;;  %3260 = vmatprep.mubr.bf16.mxu0 %v768_v48 }
 0x148   : > { %3569 = vset.pattern.permute.xlu1 %v3643_v0 }
 0x149   : > { %v685_v58 = vadd.f32 %v653_v41, %v489_v53  ;;  %1892 = vperm.xlu1 %3569, %v3002_v44  }
 0x14b   : > { %v721_v60 = vadd.f32 %v3881_v17, %v685_v58  ;;  %v1622_v61 = vpop.permute.xlu1 %1621 }
 0x14c   : > { %v1779_v49 = vmul.f32 %v3864_v3, %v1622_v61 }
 0x14d   : > { %v753_v47 = vmax.f32 %v721_v60, 0.0  ;;  %1896 = vperm.xlu1 %3569, %v3897_v37   ;;  %v3013_v60 = vld [vmem:[%s3698_s27 + $0x1f8] sm:$0xff] }
 0x14f   : > { %v769_v4 = vpack.c.bf16 %v753_v47, %v752_v2 }
 0x150   : > { %v1813_v8 = vpop.permute.xlu1 %1812 }
 0x151   : > { %3570 = vset.pattern.permute.xlu1 %v3644_v7  ;;  %3261 = vmatmul.mubr.bf16.gmra.mrb[28].mxu0 %v769_v4  ;;  %v1939_v9 = vmul.f32 %v3858_v1, %v1813_v8 }
 0x152   : > { %1736 = vperm.xlu1 %3570, %v3005_v6  }
 0x153   : > { %v1971_v11 = vadd.f32 %v1939_v9, %v1779_v49  ;;  %v4142_v49 = vld [vmem:[%s4777_s5 + $0x1] ss:$0 sm:$0xff] }
 0x154   : > { %v1817_v14 = vpop.permute.xlu1 %1816 }
 0x155   : > { %v2003_v15 = vadd.f32 %v3881_v17, %v1971_v11  ;;  %v1940_v37 = vmul.f32 %v3858_v1, %v1817_v14 }
 0x156   : > { %3571 = vset.pattern.permute.xlu1 %v3643_v0 }
 0x157   : > { %v1972_v57 = vadd.f32 %v1940_v37, %v1780_v32  ;;  %1904 = vperm.xlu1 %3571, %v3005_v6   ;;  %v2035_v18 = vmax.f32 %v2003_v15, 0.0 }
 0x159   : > { %v2004_v42 = vadd.f32 %v3881_v17, %v1972_v57  ;;  %v1637_v62 = vpop.permute.xlu1 %1636 }
 0x15a   : > { %v1782_v20 = vmul.f32 %v3864_v3, %v1637_v62 }
 0x15b   : > { %v2036_v54 = vmax.f32 %v2004_v42, 0.0  ;;  %3572 = vset.pattern.permute.xlu1 %v3644_v7  ;;  %v3599_v42 = vld [vmem:[%s4774_s2 + $0x8] sm:$0xff]  }
 0x15c   : > { %1741 = vperm.xlu1 %3572, %v3006_v19  }
 0x15d   : > { %v4101_v21 = vpack.c.bf16 %v2036_v54, %v2035_v18 }
 0x15e   : > { %v1825_v23 = vpop.permute.xlu1 %1824 }
 0x15f   : > { %v1942_v24 = vmul.f32 %v3858_v1, %v1825_v23 }
 0x160   : > { %3573 = vset.pattern.permute.xlu1 %v3643_v0 }
 0x161   : > { %v4105_v25 = vadd.f32 %v1942_v24, %v1782_v20  ;;  %1908 = vperm.xlu1 %3573, %v3006_v19  }
 0x163   : > { %v1642_v26 = vpop.permute.xlu1 %1641 }
 0x164   : > { %v1783_v28 = vmul.f32 %v3864_v3, %v1642_v26 }
 0x165   : > { %1912 = vperm.xlu1 %3573, %v3916_v12  }
 0x168   : > { %v1829_v31 = vpop.permute.xlu1 %1828 }
 0x169   : > { %3574 = vset.pattern.permute.xlu1 %v3644_v7  ;;  %v1943_v59 = vmul.f32 %v3858_v1, %v1829_v31 }
 0x16a   : > { %1756 = vperm.xlu1 %3574, %v3009_v29  }
 0x16b   : > { %v1975_v52 = vadd.f32 %v1943_v59, %v1783_v28  ;;  %v3600_v28 = vld [vmem:[%s4774_s2 + $0x10] sm:$0xff]  }
 0x16c   : > { %v1833_v50 = vpop.permute.xlu1 %1832 }
 0x16d   : > { %v2007_v36 = vadd.f32 %v3881_v17, %v1975_v52  ;;  %v1944_v38 = vmul.f32 %v3858_v1, %v1833_v50  ;;  %v3602_v52 = vld [vmem:[%s4774_s2 + $0x20] sm:$0xff]  }
 0x16e   : > { %3576 = vset.pattern.permute.xlu1 %v3643_v0 }
 0x16f   : > { %v1976_v12 = vadd.f32 %v1944_v38, %v1784_v13  ;;  %1920 = vperm.xlu1 %3576, %v3009_v29   ;;  %v2039_v43 = vmax.f32 %v2007_v36, 0.0  ;;  %v3601_v13 = vld [vmem:[%s4774_s2 + $0x18] sm:$0xff]   ;;  %v3603_v36 = vld [vmem:[%s4774_s2 + $0x28] sm:$0xff]  }
 0x171   : > { %v2008_v40 = vadd.f32 %v3881_v17, %v1976_v12  ;;  %v1657_v44 = vpop.permute.xlu1 %1656 }
 0x172   : > { %v1786_v46 = vmul.f32 %v3864_v3, %v1657_v44 }
 0x173   : > { %v2040_v45 = vmax.f32 %v2008_v40, 0.0  ;;  %3577 = vset.pattern.permute.xlu1 %v3644_v7 }
 0x174   : > { %1761 = vperm.xlu1 %3577, %v3010_v34  }
 0x175   : > { %v4122_v48 = vpack.c.bf16 %v2040_v45, %v2039_v43 }
 0x176   : > { %v1841_v56 = vpop.permute.xlu1 %1840 }
 0x177   : > { %v1946_v53 = vmul.f32 %v3858_v1, %v1841_v56 }
 0x178   : > { %3578 = vset.pattern.permute.xlu1 %v3643_v0 }
 0x179   : > { %v4126_v41 = vadd.f32 %v1946_v53, %v1786_v46  ;;  %1924 = vperm.xlu1 %3578, %v3010_v34   ;;  %v3604_v46 = vld [vmem:[%s4774_s2 + $0x30] sm:$0xff]  }
 0x17b   : > { %v1662_v17 = vpop.permute.xlu1 %1661 }
 0x17c   : > { %v1787_v58 = vmul.f32 %v3864_v3, %v1662_v17 }
 0x17d   : > { %1928 = vperm.xlu1 %3578, %v4024_v39  }
 0x180   : > { %v1845_v61 = vpop.permute.xlu1 %1844 }
 0x181   : > { %v1947_v2 = vmul.f32 %v3858_v1, %v1845_v61  ;;  %3579 = vset.pattern.permute.xlu1 %v3644_v7  ;;  %v3605_v61 = vld [vmem:[%s4774_s2 + $0x38] sm:$0xff]  }
 0x182   : > { %1776 = vperm.xlu1 %3579, %v3013_v60  }
 0x183   : > { %v4136_v47 = vadd.f32 %v1947_v2, %v1787_v58 }
 0x184   : > { %v4177_v2 = vpop.permute.xlu1 %1848 }
 0x186   : > { %3581 = vset.pattern.permute.xlu1 %v3643_v0 }
 0x187   : > { %1936 = vperm.xlu1 %3581, %v3013_v60  }
 0x193   : > { %v3234_v39 = vpop.f32.mrb[0].mxu0 }
 0x194   : > { %v881_v3 = vadd.f32 %v3234_v39, %v4142_v49  ;;  %v872_v4 = vpop.f32.mrb[1].mxu0 }
 0x195   : > { %v873_v6 = vadd.f32 %v4142_v49, %v872_v4  ;;  %v3235_v1 = vpop.f32.mrb[2].mxu0 }
 0x196   : > { %v884_v7 = vadd.f32 %v3235_v1, %v4142_v49  ;;  %v875_v8 = vpop.f32.mrb[3].mxu0  ;;  %v1001_v10 = vmax.f32 %v881_v3, 0.0 }
 0x197   : > { %v876_v9 = vadd.f32 %v4142_v49, %v875_v8  ;;  %v999_v32 = vmax.f32 %v873_v6, 0.0 }
 0x198   : > { %v1002_v0 = vmax.f32 %v884_v7, 0.0 }
 0x199   : > { %v1000_v11 = vmax.f32 %v876_v9, 0.0  ;;  %v4182_v9 = vpop.permute.xlu1 %1676 }
 0x19a   : > { %v1032_v14 = vpack.c.bf16 %v1002_v0, %v1001_v10 }
 0x19b   : > { %v3238_v15 = vpop.f32.mrb[4].mxu0  ;;  %v1031_v37 = vpack.c.bf16 %v1000_v11, %v999_v32 }
 0x19c   : > { %v897_v57 = vadd.f32 %v3238_v15, %v4142_v49  ;;  %v888_v18 = vpop.f32.mrb[5].mxu0 }
 0x19d   : > { %v889_v62 = vadd.f32 %v4142_v49, %v888_v18  ;;  %v3239_v19 = vpop.f32.mrb[6].mxu0  ;;  %3280 = vmatprep.mubr.bf16.mxu1 %v1031_v37 }
 0x19e   : > { %v900_v54 = vadd.f32 %v3239_v19, %v4142_v49  ;;  %v891_v20 = vpop.f32.mrb[7].mxu0  ;;  %3281 = vmatmul.mubr.bf16.vlgmr.msra.gmra.mrb[0].mxu1 %v1032_v14  ;;  %v1005_v24 = vmax.f32 %v897_v57, 0.0  ;;  %v4185_v57 = vpop.permute.xlu1 %1856 }
 0x19f   : > { %v892_v23 = vadd.f32 %v4142_v49, %v891_v20  ;;  %3361 = vmatpush3.bf16.msra.mxu1 %v3598_v55  ;;  %v1003_v29 = vmax.f32 %v889_v62, 0.0  ;;  %v3606_v62 = vld [vmem:[%s4776_s4] sm:$0xff]  }
 0x1a0   : > { %v1006_v26 = vmax.f32 %v900_v54, 0.0  ;;  %3362 = vmatprep.subr.bf16.mxu1 %v3599_v42  ;;  %3312 = vmatprep.subr.bf16.mxu0 %v3606_v62 }
 0x1a1   : > { %v1004_v31 = vmax.f32 %v892_v23, 0.0  ;;  %3313 = vmatpush3.bf16.msra.mxu0 %v3606_v62 }
 0x1a2   : > { %v1034_v59 = vpack.c.bf16 %v1006_v26, %v1005_v24  ;;  %v4187_v18 = vpop.permute.xlu1 %1681 }
 0x1a3   : > { %v1033_v33 = vpack.c.bf16 %v1004_v31, %v1003_v29  ;;  %3363 = vmatpush3.bf16.msra.mxu1 %v3599_v42 }
 0x1a4   : > { %3364 = vmatprep.subr.bf16.mxu1 %v3600_v28 }
 0x1a5   : > { %3284 = vmatprep.mubr.bf16.mxu1 %v1033_v33  ;;  %v3608_v33 = vld [vmem:[%s4776_s4 + $0x10] sm:$0xff]  }
 0x1a6   : > { %3285 = vmatmul.mubr.bf16.gmra.mrb[4].mxu1 %v1034_v59  ;;  %v4189_v42 = vpop.permute.xlu1 %1860 }
 0x1a7   : > { %3365 = vmatpush3.bf16.msra.mxu1 %v3600_v28  ;;  %v3607_v28 = vld [vmem:[%s4776_s4 + $0x8] sm:$0xff]  }
 0x1a8   : > { %3366 = vmatprep.subr.bf16.mxu1 %v3601_v13  ;;  %3314 = vmatprep.subr.bf16.mxu0 %v3607_v28 }
 0x1a9   : > { %3315 = vmatpush3.bf16.msra.mxu0 %v3607_v28 }
 0x1aa   : > { %v4195_v23 = vpop.permute.xlu1 %1864  ;;  %3316 = vmatprep.subr.bf16.mxu0 %v3608_v33 }
 0x1ab   : > { %3367 = vmatpush3.bf16.msra.mxu1 %v3601_v13 }
 0x1ac   : > { %v3242_v50 = vpop.f32.mrb[8].mxu0  ;;  %3368 = vmatprep.subr.bf16.mxu1 %v3602_v52 }
 0x1ad   : > { %v913_v38 = vadd.f32 %v3242_v50, %v4142_v49  ;;  %v904_v12 = vpop.f32.mrb[9].mxu0  ;;  %3317 = vmatpush3.bf16.msra.mxu0 %v3608_v33 }
 0x1ae   : > { %v905_v43 = vadd.f32 %v4142_v49, %v904_v12  ;;  %v3243_v40 = vpop.f32.mrb[10].mxu0  ;;  %v4206_v12 = vpop.permute.xlu1 %1696 }
 0x1af   : > { %v916_v44 = vadd.f32 %v3243_v40, %v4142_v49  ;;  %v907_v34 = vpop.f32.mrb[11].mxu0  ;;  %3369 = vmatpush3.bf16.msra.mxu1 %v3602_v52  ;;  %v1009_v56 = vmax.f32 %v913_v38, 0.0  ;;  %v3609_v40 = vld [vmem:[%s4776_s4 + $0x18] sm:$0xff]  }
 0x1b0   : > { %v908_v45 = vadd.f32 %v4142_v49, %v907_v34  ;;  %3370 = vmatprep.subr.bf16.mxu1 %v3603_v36  ;;  %v1007_v17 = vmax.f32 %v905_v43, 0.0  ;;  %3318 = vmatprep.subr.bf16.mxu0 %v3609_v40 }
 0x1b1   : > { %v1010_v53 = vmax.f32 %v916_v44, 0.0  ;;  %v3610_v44 = vld [vmem:[%s4776_s4 + $0x20] sm:$0xff]   ;;  %3319 = vmatpush3.bf16.msra.mxu0 %v3609_v40 }
 0x1b2   : > { %v1008_v55 = vmax.f32 %v908_v45, 0.0  ;;  %v4214_v34 = vpop.permute.xlu1 %1872  ;;  %3320 = vmatprep.subr.bf16.mxu0 %v3610_v44 }
 0x1b3   : > { %v1036_v58 = vpack.c.bf16 %v1010_v53, %v1009_v56  ;;  %3371 = vmatpush3.bf16.msra.mxu1 %v3603_v36  ;;  %v3612_v56 = vld [vmem:[%s4776_s4 + $0x30] sm:$0xff]  }
 0x1b4   : > { %v1035_v60 = vpack.c.bf16 %v1008_v55, %v1007_v17  ;;  %3372 = vmatprep.subr.bf16.mxu1 %v3604_v46 }
 0x1b5   : > { %3321 = vmatpush3.bf16.msra.mxu0 %v3610_v44 }
 0x1b6   : > { %3288 = vmatprep.mubr.bf16.mxu1 %v1035_v60  ;;  %v4216_v45 = vpop.permute.xlu1 %1701 }
 0x1b7   : > { %3289 = vmatmul.mubr.bf16.gmra.mrb[8].mxu1 %v1036_v58 }
 0x1b8   : > { %3373 = vmatpush3.bf16.msra.mxu1 %v3604_v46  ;;  %v3611_v46 = vld [vmem:[%s4776_s4 + $0x28] sm:$0xff]  }
 0x1b9   : > { %3374 = vmatprep.subr.bf16.mxu1 %v3605_v61  ;;  %3322 = vmatprep.subr.bf16.mxu0 %v3611_v46 }
 0x1ba   : > { %3323 = vmatpush3.bf16.msra.mxu0 %v3611_v46  ;;  %v4224_v53 = vpop.permute.xlu1 %1876 }
 0x1bb   : > { %3324 = vmatprep.subr.bf16.mxu0 %v3612_v56 }
 0x1bc   : > { %3375 = vmatpush3.bf16.msra.mxu1 %v3605_v61 }
 0x1be   : > { %3325 = vmatpush3.bf16.msra.mxu0 %v3612_v56 }
 0x1c4   : > { %v3246_v39 = vpop.f32.mrb[12].mxu0 }
 0x1c5   : > { %v929_v3 = vadd.f32 %v3246_v39, %v4142_v49  ;;  %v920_v4 = vpop.f32.mrb[13].mxu0  ;;  %v3613_v39 = vld [vmem:[%s4776_s4 + $0x38] sm:$0xff]  }
 0x1c6   : > { %v921_v6 = vadd.f32 %v4142_v49, %v920_v4  ;;  %v3247_v1 = vpop.f32.mrb[14].mxu0  ;;  %3326 = vmatprep.subr.bf16.mxu0 %v3613_v39 }
 0x1c7   : > { %v932_v7 = vadd.f32 %v3247_v1, %v4142_v49  ;;  %v923_v8 = vpop.f32.mrb[15].mxu0  ;;  %v1013_v0 = vmax.f32 %v929_v3, 0.0  ;;  %3327 = vmatpush3.bf16.msra.mxu0 %v3613_v39  ;;  %v4259_v39 = vld [vmem:[%s4773_s1 + $0x1] ss:$0 sm:$0xff] }
 0x1c8   : > { %v924_v10 = vadd.f32 %v4142_v49, %v923_v8  ;;  %v1011_v11 = vmax.f32 %v921_v6, 0.0  ;;  %v4233_v8 = vpop.permute.xlu1 %1880 }
 0x1c9   : > { %v1014_v32 = vmax.f32 %v932_v7, 0.0 }
 0x1ca   : > { %v1012_v14 = vmax.f32 %v924_v10, 0.0 }
 0x1cb   : > { %v1038_v15 = vpack.c.bf16 %v1014_v32, %v1013_v0 }
 0x1cc   : > { %v1037_v37 = vpack.c.bf16 %v1012_v14, %v1011_v11  ;;  %v4235_v14 = vpop.permute.xlu1 %1716 }
 0x1ce   : > { %3292 = vmatprep.mubr.bf16.mxu1 %v1037_v37 }
 0x1cf   : > { %3293 = vmatmul.mubr.bf16.gmra.mrb[12].mxu1 %v1038_v15 }
 0x1d0   : > { %v4237_v15 = vpop.permute.xlu1 %1888 }
 0x1d4   : > { %v4239_v37 = vpop.permute.xlu1 %1721 }
 0x1dc   : > { %v3250_v19 = vpop.f32.mrb[16].mxu0 }
 0x1dd   : > { %v945_v54 = vadd.f32 %v3250_v19, %v4142_v49  ;;  %v936_v20 = vpop.f32.mrb[17].mxu0  ;;  %v1652_v19 = vpop.permute.xlu0 %1651 }
 0x1de   : > { %v937_v24 = vadd.f32 %v4142_v49, %v936_v20  ;;  %v3251_v26 = vpop.f32.mrb[18].mxu0 }
 0x1df   : > { %v948_v29 = vadd.f32 %v3251_v26, %v4142_v49  ;;  %v939_v31 = vpop.f32.mrb[19].mxu0  ;;  %v1017_v13 = vmax.f32 %v945_v54, 0.0 }
 0x1e0   : > { %v940_v59 = vadd.f32 %v4142_v49, %v939_v31  ;;  %v1015_v50 = vmax.f32 %v937_v24, 0.0  ;;  %v4244_v31 = vpop.permute.xlu1 %1892 }
 0x1e1   : > { %v1018_v52 = vmax.f32 %v948_v29, 0.0 }
 0x1e2   : > { %v1016_v36 = vmax.f32 %v940_v59, 0.0 }
 0x1e3   : > { %v1040_v38 = vpack.c.bf16 %v1018_v52, %v1017_v13 }
 0x1e4   : > { %v1039_v43 = vpack.c.bf16 %v1016_v36, %v1015_v50  ;;  %v1667_v36 = vpop.permute.xlu0 %1666  ;;  %v4247_v40 = vpop.permute.xlu1 %1896 }
 0x1e6   : > { %3296 = vmatprep.mubr.bf16.mxu1 %v1039_v43 }
 0x1e7   : > { %3297 = vmatmul.mubr.bf16.gmra.mrb[16].mxu1 %v1040_v38 }
 0x1e8   : > { %v1672_v44 = vpop.permute.xlu0 %1671  ;;  %v4249_v46 = vpop.permute.xlu1 %1736 }
 0x1ec   : > { %v1687_v56 = vpop.permute.xlu0 %1686 }
 0x1f4   : > { %v3254_v17 = vpop.f32.mrb[20].mxu0 }
 0x1f5   : > { %v961_v55 = vadd.f32 %v3254_v17, %v4142_v49  ;;  %v952_v58 = vpop.f32.mrb[21].mxu0  ;;  %v4251_v17 = vpop.permute.xlu1 %1904 }
 0x1f6   : > { %v953_v60 = vadd.f32 %v4142_v49, %v952_v58  ;;  %v3255_v61 = vpop.f32.mrb[22].mxu0  ;;  %v4253_v58 = vpop.permute.xlu0 %1691 }
 0x1f7   : > { %v964_v3 = vadd.f32 %v3255_v61, %v4142_v49  ;;  %v955_v4 = vpop.f32.mrb[23].mxu0  ;;  %v1021_v1 = vmax.f32 %v961_v55, 0.0 }
 0x1f8   : > { %v956_v6 = vadd.f32 %v4142_v49, %v955_v4  ;;  %v1019_v10 = vmax.f32 %v953_v60, 0.0  ;;  %v4266_v4 = vld [vmem:[%s4773_s1] ss:$0 sm:$0xff] }
 0x1f9   : > { %v1022_v7 = vmax.f32 %v964_v3, 0.0  ;;  %v1941_v3 = vmul.f32 %v4259_v39, %v4042_v5 }
 0x1fa   : > { %v1020_v0 = vmax.f32 %v956_v6, 0.0  ;;  %v1781_v6 = vmul.f32 %v4266_v4, %v4107_v27  ;;  %v4279_v27 = vld [vmem:[%s4777_s5] ss:$0 sm:$0xff] }
 0x1fb   : > { %v1042_v32 = vpack.c.bf16 %v1022_v7, %v1021_v1  ;;  %v4270_v1 = vpop.permute.xlu1 %1741 }
 0x1fc   : > { %v1041_v11 = vpack.c.bf16 %v1020_v0, %v1019_v10 }
 0x1fe   : > { %3300 = vmatprep.mubr.bf16.mxu1 %v1041_v11 }
 0x1ff   : > { %3301 = vmatmul.mubr.bf16.gmra.mrb[20].mxu1 %v1042_v32 }
 0x20c   : > { %v3258_v62 = vpop.f32.mrb[24].mxu0 }
 0x20d   : > { %v977_v54 = vadd.f32 %v3258_v62, %v4142_v49  ;;  %v968_v20 = vpop.f32.mrb[25].mxu0 }
 0x20e   : > { %v969_v24 = vadd.f32 %v4142_v49, %v968_v20  ;;  %v3259_v26 = vpop.f32.mrb[26].mxu0 }
 0x20f   : > { %v980_v28 = vadd.f32 %v3259_v26, %v4142_v49  ;;  %v971_v29 = vpop.f32.mrb[27].mxu0  ;;  %v1025_v33 = vmax.f32 %v977_v54, 0.0  ;;  %v1973_v54 = vadd.f32 %v1941_v3, %v1781_v6  ;;  %v1707_v26 = vpop.permute.xlu0 %1706  ;;  %v2010_v3 = vadd.f32 %v4279_v27, %v4126_v41 }
 0x210   : > { %v972_v59 = vadd.f32 %v4142_v49, %v971_v29  ;;  %v1023_v52 = vmax.f32 %v969_v24, 0.0  ;;  %v1788_v29 = vmul.f32 %v4266_v4, %v1667_v36  ;;  %v1785_v36 = vmul.f32 %v4266_v4, %v1652_v19 }
 0x211   : > { %v1026_v13 = vmax.f32 %v980_v28, 0.0  ;;  %v1790_v6 = vmul.f32 %v4266_v4, %v4182_v9  ;;  %v1952_v41 = vmul.f32 %v4259_v39, %v4195_v23  ;;  %v1789_v9 = vmul.f32 %v4266_v4, %v1672_v44 }
 0x212   : > { %v1024_v50 = vmax.f32 %v972_v59, 0.0  ;;  %v2006_v59 = vadd.f32 %v4279_v27, %v4105_v25  ;;  %v1954_v44 = vmul.f32 %v4259_v39, %v4214_v34  ;;  %v1795_v34 = vmul.f32 %v4266_v4, %v4216_v45 }
 0x213   : > { %v1044_v38 = vpack.c.bf16 %v1026_v13, %v1025_v33  ;;  %v4285_v33 = vpop.permute.xlu1 %1908  ;;  %v4292_v25 = vpop.permute.xlu0 %1711 }
 0x214   : > { %v1043_v43 = vpack.c.bf16 %v1024_v50, %v1023_v52  ;;  %v2005_v52 = vadd.f32 %v4279_v27, %v1973_v54  ;;  %v1945_v50 = vmul.f32 %v4259_v39, %v4050_v16  ;;  %v2011_v16 = vadd.f32 %v4279_v27, %v4136_v47 }
 0x215   : > { %v1949_v47 = vmul.f32 %v4259_v39, %v4057_v22  ;;  %v1794_v22 = vmul.f32 %v4266_v4, %v4206_v12 }
 0x216   : > { %3304 = vmatprep.mubr.bf16.mxu1 %v1043_v43 }
 0x217   : > { %3305 = vmatmul.mubr.bf16.gmra.mrb[24].mxu1 %v1044_v38  ;;  %v2038_v38 = vmax.f32 %v2006_v59, 0.0 }
 0x224   : > { %v3262_v55 = vpop.f32.mrb[28].mxu0 }
 0x225   : > { %v993_v60 = vadd.f32 %v3262_v55, %v4142_v49  ;;  %v984_v61 = vpop.f32.mrb[29].mxu0  ;;  %v2037_v55 = vmax.f32 %v2005_v52, 0.0 }
 0x226   : > { %v985_v7 = vadd.f32 %v4142_v49, %v984_v61  ;;  %v3263_v10 = vpop.f32.mrb[30].mxu0 }
 0x227   : > { %v996_v0 = vadd.f32 %v3263_v10, %v4142_v49  ;;  %v987_v32 = vpop.f32.mrb[31].mxu0  ;;  %v1029_v62 = vmax.f32 %v993_v60, 0.0  ;;  %v1977_v60 = vadd.f32 %v1945_v50, %v1785_v36  ;;  %v2068_v61 = vpack.c.bf16 %v2038_v38, %v2037_v55 }
 0x228   : > { %v988_v11 = vadd.f32 %v4142_v49, %v987_v32  ;;  %v1027_v20 = vmax.f32 %v985_v7, 0.0  ;;  %v1948_v49 = vmul.f32 %v4259_v39, %v4177_v2  ;;  %v4294_v2 = vpop.permute.xlu1 %1912  ;;  %v1791_v7 = vmul.f32 %v4266_v4, %v4187_v18 }
 0x229   : > { %v1030_v5 = vmax.f32 %v996_v0, 0.0  ;;  %v1951_v10 = vmul.f32 %v4259_v39, %v4189_v42  ;;  %v1792_v0 = vmul.f32 %v4266_v4, %v1687_v56  ;;  %v2009_v32 = vadd.f32 %v4279_v27, %v1977_v60 }
 0x22a   : > { %v1028_v24 = vmax.f32 %v988_v11, 0.0  ;;  %v1980_v43 = vadd.f32 %v1948_v49, %v1788_v29  ;;  %v1727_v11 = vpop.permute.xlu0 %1726  ;;  %v2043_v18 = vmax.f32 %v2011_v16, 0.0  ;;  %v1986_v36 = vadd.f32 %v1954_v44, %v1794_v22 }
 0x22b   : > { %v1046_v28 = vpack.c.bf16 %v1030_v5, %v1029_v62  ;;  %v1983_v5 = vadd.f32 %v1951_v10, %v1791_v7  ;;  %v1984_v54 = vadd.f32 %v1952_v41, %v1792_v0  ;;  %v2041_v23 = vmax.f32 %v2009_v32, 0.0 }
 0x22c   : > { %v1045_v13 = vpack.c.bf16 %v1028_v24, %v1027_v20  ;;  %v2012_v19 = vadd.f32 %v4279_v27, %v1980_v43  ;;  %v4316_v62 = vpop.permute.xlu1 %1756  ;;  %v1981_v20 = vadd.f32 %v1949_v47, %v1789_v9  ;;  %v1953_v24 = vmul.f32 %v4259_v39, %v4064_v30 }
 0x22d   : > { %v2015_v49 = vadd.f32 %v4279_v27, %v1983_v5  ;;  %v2016_v12 = vadd.f32 %v4279_v27, %v1984_v54  ;;  %v1955_v30 = vmul.f32 %v4259_v39, %v4224_v53  ;;  %v1800_v53 = vmul.f32 %v4266_v4, %v1727_v11 }
 0x22e   : > { %3308 = vmatprep.mubr.bf16.mxu1 %v1045_v13  ;;  %v2044_v42 = vmax.f32 %v2012_v19, 0.0  ;;  %v4328_v29 = vpop.permute.xlu0 %1731  ;;  %v2013_v50 = vadd.f32 %v4279_v27, %v1981_v20  ;;  %v1799_v7 = vmul.f32 %v4266_v4, %v4239_v37  ;;  %v1959_v10 = vmul.f32 %v4259_v39, %v4244_v31 }
 0x22f   : > { %3309 = vmatmul.mubr.bf16.gmra.mrb[28].mxu1 %v1046_v28  ;;  %v1793_v28 = vmul.f32 %v4266_v4, %v4253_v58  ;;  %v1956_v58 = vmul.f32 %v4259_v39, %v4233_v8  ;;  %v2047_v55 = vmax.f32 %v2015_v49, 0.0  ;;  %v2048_v60 = vmax.f32 %v2016_v12, 0.0 }
 0x230   : > { %3376 = vmatprep.mubr.bf16.mxu1 %v4101_v21  ;;  %v1950_v21 = vmul.f32 %v4259_v39, %v4185_v57  ;;  %v2042_v57 = vmax.f32 %v2010_v3, 0.0  ;;  %v2071_v52 = vpack.c.bf16 %v2044_v42, %v2043_v18  ;;  %v2045_v16 = vmax.f32 %v2013_v50, 0.0 }
 0x231   : > { %v1985_v38 = vadd.f32 %v1953_v24, %v1793_v28  ;;  %v2018_v8 = vadd.f32 %v4279_v27, %v1986_v36  ;;  %v1960_v0 = vmul.f32 %v4259_v39, %v4247_v40  ;;  %v1957_v41 = vmul.f32 %v4259_v39, %v4071_v35 }
 0x232   : > { %v1982_v56 = vadd.f32 %v1950_v21, %v1790_v6  ;;  %v2070_v13 = vpack.c.bf16 %v2042_v57, %v2041_v23  ;;  %v1747_v19 = vpop.permute.xlu0 %1746  ;;  %v1798_v6 = vmul.f32 %v4266_v4, %v4235_v14  ;;  %v1958_v21 = vmul.f32 %v4259_v39, %v4237_v15 }
 0x233   : > { %v2017_v47 = vadd.f32 %v4279_v27, %v1985_v38  ;;  %v1797_v14 = vmul.f32 %v4266_v4, %v4292_v25  ;;  %v2073_v37 = vpack.c.bf16 %v2048_v60, %v2047_v55  ;;  %v2050_v11 = vmax.f32 %v2018_v8, 0.0 }
 0x234   : > { %v2014_v59 = vadd.f32 %v4279_v27, %v1982_v56  ;;  %v1990_v31 = vadd.f32 %v1958_v21, %v1798_v6  ;;  %v1991_v57 = vadd.f32 %v1959_v10, %v1799_v7  ;;  %v1992_v18 = vadd.f32 %v1960_v0, %v1800_v53 }
 0x235   : > { %v2049_v35 = vmax.f32 %v2017_v47, 0.0  ;;  %v1989_v56 = vadd.f32 %v1957_v41, %v1797_v14  ;;  %v1802_v44 = vmul.f32 %v4266_v4, %v4249_v46  ;;  %v1962_v24 = vmul.f32 %v4259_v39, %v4251_v17 }
 0x236   : > { %v2046_v43 = vmax.f32 %v2014_v59, 0.0  ;;  %v1752_v42 = vpop.permute.xlu0 %1751  ;;  %v2022_v23 = vadd.f32 %v4279_v27, %v1990_v31  ;;  %v2023_v25 = vadd.f32 %v4279_v27, %v1991_v57  ;;  %v2024_v20 = vadd.f32 %v4279_v27, %v1992_v18 }
 0x237   : > { %3377 = vmatmul.mubr.bf16.vlgmr.msra.gmra.mrb[32].mxu1 %v2068_v61  ;;  %v1987_v61 = vadd.f32 %v1955_v30, %v1795_v34  ;;  %v2074_v22 = vpack.c.bf16 %v2050_v11, %v2049_v35  ;;  %v1803_v28 = vmul.f32 %v4266_v4, %v4270_v1  ;;  %v2021_v49 = vadd.f32 %v4279_v27, %v1989_v56 }
 0x238   : > { %3380 = vmatprep.mubr.bf16.mxu1 %v4122_v48  ;;  %v1796_v48 = vmul.f32 %v4266_v4, %v1707_v26  ;;  %v4339_v26 = vpop.permute.xlu1 %1920  ;;  %v2072_v32 = vpack.c.bf16 %v2046_v43, %v2045_v16  ;;  %v1961_v46 = vmul.f32 %v4259_v39, %v4079_v51  ;;  %v1801_v17 = vmul.f32 %v4266_v4, %v4328_v29 }
 0x239   : > { %v2019_v15 = vadd.f32 %v4279_v27, %v1987_v61  ;;  %v2054_v1 = vmax.f32 %v2022_v23, 0.0  ;;  %v2055_v30 = vmax.f32 %v2023_v25, 0.0  ;;  %v2053_v36 = vmax.f32 %v2021_v49, 0.0 }
 0x23a   : > { %v1988_v3 = vadd.f32 %v1956_v58, %v1796_v48  ;;  %v1963_v48 = vmul.f32 %v4259_v39, %v4285_v33  ;;  %v1767_v59 = vpop.permute.xlu0 %1766  ;;  %v2056_v33 = vmax.f32 %v2024_v20, 0.0  ;;  %v1994_v58 = vadd.f32 %v1962_v24, %v1802_v44 }
 0x23b   : > { %v2051_v5 = vmax.f32 %v2019_v15, 0.0  ;;  %v1993_v43 = vadd.f32 %v1961_v46, %v1801_v17  ;;  %v2076_v61 = vpack.c.bf16 %v2054_v1, %v2053_v36  ;;  %v1806_v16 = vmul.f32 %v4266_v4, %v4316_v62 }
 0x23c   : > { %v4342_v45 = vpop.permute.xlu1 %1761  ;;  %v2020_v9 = vadd.f32 %v4279_v27, %v1988_v3  ;;  %v1995_v50 = vadd.f32 %v1963_v48, %v1803_v28  ;;  %v2077_v3 = vpack.c.bf16 %v2056_v33, %v2055_v30  ;;  %v2026_v51 = vadd.f32 %v4279_v27, %v1994_v58 }
 0x23d   : > { %v1966_v53 = vmul.f32 %v4259_v39, %v4339_v26  ;;  %v1807_v8 = vmul.f32 %v4266_v4, %v4342_v45  ;;  %v1965_v7 = vmul.f32 %v4259_v39, %v4086_v63  ;;  %v2025_v10 = vadd.f32 %v4279_v27, %v1993_v43  ;;  %v4401_v45 = vld [vmem:[%s4775_s3] sm:$0xff]  }
 0x23e   : > { %v2052_v54 = vmax.f32 %v2020_v9, 0.0  ;;  %v1772_v55 = vpop.permute.xlu0 %1771  ;;  %v2027_v29 = vadd.f32 %v4279_v27, %v1995_v50  ;;  %v1805_v0 = vmul.f32 %v4266_v4, %v1752_v42  ;;  %v2058_v62 = vmax.f32 %v2026_v51, 0.0  ;;  %3408 = vmatprep.subr.bf16.mxu0 %v4401_v45 }
 0x23f   : > { %3381 = vmatmul.mubr.bf16.gmra.mrb[36].mxu1 %v2070_v13  ;;  %v1804_v13 = vmul.f32 %v4266_v4, %v1747_v19  ;;  %v1998_v26 = vadd.f32 %v1966_v53, %v1806_v16  ;;  %v2057_v63 = vmax.f32 %v2025_v10, 0.0  ;;  %v1809_v11 = vmul.f32 %v4266_v4, %v1772_v55 }
 0x240   : > { %3384 = vmatprep.mubr.bf16.mxu1 %v2071_v52  ;;  %v1925_v40 = vpop.permute.xlu1 %1924  ;;  %v1964_v52 = vmul.f32 %v4259_v39, %v4294_v2  ;;  %v2075_v34 = vpack.c.bf16 %v2052_v54, %v2051_v5  ;;  %v1808_v2 = vmul.f32 %v4266_v4, %v1767_v59  ;;  %v2059_v47 = vmax.f32 %v2027_v29, 0.0 }
 0x241   : > { %v1967_v6 = vmul.f32 %v4259_v39, %v1925_v40  ;;  %v2030_v57 = vadd.f32 %v4279_v27, %v1998_v26  ;;  %v2078_v42 = vpack.c.bf16 %v2058_v62, %v2057_v63  ;;  %v3617_v26 = vld [vmem:[%s4775_s3 + $0x18] sm:$0xff]  }
 0x242   : > { %v1996_v38 = vadd.f32 %v1964_v52, %v1804_v13  ;;  %v1933_v41 = vpop.permute.xlu0 %1932  ;;  %v4417_v52 = vld [vmem:[%s4777_s5 + $0x2] ss:$0 sm:$0xff] }
 0x243   : > { %v1999_v14 = vadd.f32 %v1967_v6, %v1807_v8  ;;  %v1969_v31 = vmul.f32 %v4259_v39, %v1933_v41  ;;  %v2062_v23 = vmax.f32 %v2030_v57, 0.0  ;;  %v3618_v41 = vld [vmem:[%s4775_s3 + $0x20] sm:$0xff]  }
 0x244   : > { %v1929_v12 = vpop.permute.xlu1 %1928  ;;  %v2028_v19 = vadd.f32 %v4279_v27, %v1996_v38 }
 0x245   : > { %v1968_v21 = vmul.f32 %v4259_v39, %v1929_v12  ;;  %v2031_v35 = vadd.f32 %v4279_v27, %v1999_v14  ;;  %v2001_v25 = vadd.f32 %v1969_v31, %v1809_v11  ;;  %v3620_v31 = vld [vmem:[%s4775_s3 + $0x30] sm:$0xff]  }
 0x247   : > { %3385 = vmatmul.mubr.bf16.gmra.mrb[40].mxu1 %v2072_v32  ;;  %v2060_v32 = vmax.f32 %v2028_v19, 0.0  ;;  %v2000_v15 = vadd.f32 %v1968_v21, %v1808_v2  ;;  %v3616_v21 = vld [vmem:[%s4775_s3 + $0x10] sm:$0xff]  }
 0x248   : > { %3388 = vmatprep.mubr.bf16.mxu1 %v2073_v37  ;;  %v1777_v60 = vpop.permute.xlu1 %1776  ;;  %v1997_v37 = vadd.f32 %v1965_v7, %v1805_v0 }
 0x249   : > { %v1810_v18 = vmul.f32 %v4266_v4, %v1777_v60  ;;  %v2032_v56 = vadd.f32 %v4279_v27, %v2000_v15  ;;  %v2079_v5 = vpack.c.bf16 %v2060_v32, %v2059_v47  ;;  %v2033_v4 = vadd.f32 %v4279_v27, %v2001_v25  ;;  %v3619_v47 = vld [vmem:[%s4775_s3 + $0x28] sm:$0xff]  }
 0x24a   : > { %v2029_v54 = vadd.f32 %v4279_v27, %v1997_v37 }
 0x24b   : > { %v2064_v44 = vmax.f32 %v2032_v56, 0.0  ;;  %v2065_v59 = vmax.f32 %v2033_v4, 0.0 }
 0x24c   : > { %v1937_v9 = vpop.permute.xlu1 %1936  ;;  %v2061_v24 = vmax.f32 %v2029_v54, 0.0 }
 0x24d   : > { %v1970_v40 = vmul.f32 %v4259_v39, %v1937_v9 }
 0x24e   : > { %v2080_v28 = vpack.c.bf16 %v2062_v23, %v2061_v24 }
 0x24f   : > { %3389 = vmatmul.mubr.bf16.gmra.mrb[44].mxu1 %v2074_v22  ;;  %v2002_v20 = vadd.f32 %v1970_v40, %v1810_v18  ;;  %v2063_v22 = vmax.f32 %v2031_v35, 0.0 }
 0x250   : > { %3392 = vmatprep.mubr.bf16.mxu1 %v2075_v34 }
 0x251   : > { %v2034_v39 = vadd.f32 %v4279_v27, %v2002_v20  ;;  %v2081_v48 = vpack.c.bf16 %v2064_v44, %v2063_v22 }
 0x253   : > { %v2066_v49 = vmax.f32 %v2034_v39, 0.0 }
 0x255   : > { %v2082_v13 = vpack.c.bf16 %v2066_v49, %v2065_v59 }
 0x257   : > { %3393 = vmatmul.mubr.bf16.gmra.mrb[48].mxu1 %v2076_v61 }
 0x258   : > { %3396 = vmatprep.mubr.bf16.mxu1 %v2077_v3  ;;  %v3615_v3 = vld [vmem:[%s4775_s3 + $0x8] sm:$0xff]  }
 0x25f   : > { %3397 = vmatmul.mubr.bf16.gmra.mrb[52].mxu1 %v2078_v42 }
 0x260   : > { %3400 = vmatprep.mubr.bf16.mxu1 %v2079_v5  ;;  %v3621_v5 = vld [vmem:[%s4775_s3 + $0x38] sm:$0xff]  }
 0x267   : > { %3401 = vmatmul.mubr.bf16.gmra.mrb[56].mxu1 %v2080_v28 }
 0x268   : > { %3404 = vmatprep.mubr.bf16.mxu1 %v2081_v48 }
 0x26f   : > { %3405 = vmatmul.mubr.bf16.gmra.mrb[60].mxu1 %v2082_v13 }
 0x271   : > { %v3282_v12 = vpop.f32.mrb[0].mxu1 }
 0x272   : > { %v1158_v34 = vadd.f32 %v3282_v12, %v4417_v52  ;;  %v1149_v46 = vpop.f32.mrb[1].mxu1 }
 0x273   : > { %v1150_v17 = vadd.f32 %v4417_v52, %v1149_v46  ;;  %v3283_v27 = vpop.f32.mrb[2].mxu1 }
 0x274   : > { %v1161_v1 = vadd.f32 %v3283_v27, %v4417_v52  ;;  %v1152_v30 = vpop.f32.mrb[3].mxu1  ;;  %v1278_v58 = vmax.f32 %v1158_v34, 0.0 }
 0x275   : > { %v1153_v33 = vadd.f32 %v4417_v52, %v1152_v30  ;;  %v1276_v36 = vmax.f32 %v1150_v17, 0.0 }
 0x276   : > { %v1279_v50 = vmax.f32 %v1161_v1, 0.0 }
 0x277   : > { %v1277_v38 = vmax.f32 %v1153_v33, 0.0 }
 0x278   : > { %v1309_v43 = vpack.c.bf16 %v1279_v50, %v1278_v58 }
 0x279   : > { %v1308_v55 = vpack.c.bf16 %v1277_v38, %v1276_v36  ;;  %v3286_v2 = vpop.f32.mrb[4].mxu1 }
 0x27a   : > { %v1174_v60 = vadd.f32 %v3286_v2, %v4417_v52  ;;  %v1165_v61 = vpop.f32.mrb[5].mxu1 }
 0x27b   : > { %v1166_v51 = vadd.f32 %v4417_v52, %v1165_v61  ;;  %v3287_v29 = vpop.f32.mrb[6].mxu1  ;;  %3328 = vmatprep.mubr.bf16.mxu0 %v1308_v55 }
 0x27c   : > { %v1177_v16 = vadd.f32 %v3287_v29, %v4417_v52  ;;  %v1168_v53 = vpop.f32.mrb[7].mxu1  ;;  %3329 = vmatmul.mubr.bf16.vlgmr.msra.gmra.mrb[32].mxu0 %v1309_v43  ;;  %v1282_v8 = vmax.f32 %v1174_v60, 0.0 }
 0x27d   : > { %v1169_v19 = vadd.f32 %v4417_v52, %v1168_v53  ;;  %3409 = vmatpush3.bf16.msra.mxu0 %v4401_v45  ;;  %v1280_v7 = vmax.f32 %v1166_v51, 0.0 }
 0x27e   : > { %v1283_v6 = vmax.f32 %v1177_v16, 0.0  ;;  %3410 = vmatprep.subr.bf16.mxu0 %v3615_v3 }
 0x27f   : > { %v1281_v10 = vmax.f32 %v1169_v19, 0.0 }
 0x280   : > { %v1311_v0 = vpack.c.bf16 %v1283_v6, %v1282_v8 }
 0x281   : > { %v1310_v62 = vpack.c.bf16 %v1281_v10, %v1280_v7  ;;  %3411 = vmatpush3.bf16.msra.mxu0 %v3615_v3 }
 0x282   : > { %3412 = vmatprep.subr.bf16.mxu0 %v3616_v21 }
 0x283   : > { %3332 = vmatprep.mubr.bf16.mxu0 %v1310_v62 }
 0x284   : > { %3333 = vmatmul.mubr.bf16.gmra.mrb[36].mxu0 %v1311_v0 }
 0x285   : > { %3413 = vmatpush3.bf16.msra.mxu0 %v3616_v21 }
 0x286   : > { %3414 = vmatprep.subr.bf16.mxu0 %v3617_v26 }
 0x289   : > { %3415 = vmatpush3.bf16.msra.mxu0 %v3617_v26 }
 0x28a   : > { %v3290_v45 = vpop.f32.mrb[8].mxu1  ;;  %3416 = vmatprep.subr.bf16.mxu0 %v3618_v41 }
 0x28b   : > { %v1190_v32 = vadd.f32 %v3290_v45, %v4417_v52  ;;  %v1181_v14 = vpop.f32.mrb[9].mxu1 }
 0x28c   : > { %v1182_v15 = vadd.f32 %v4417_v52, %v1181_v14  ;;  %v3291_v9 = vpop.f32.mrb[10].mxu1 }
 0x28d   : > { %v1193_v63 = vadd.f32 %v3291_v9, %v4417_v52  ;;  %v1184_v37 = vpop.f32.mrb[11].mxu1  ;;  %3417 = vmatpush3.bf16.msra.mxu0 %v3618_v41  ;;  %v1286_v57 = vmax.f32 %v1190_v32, 0.0 }
 0x28e   : > { %v1185_v11 = vadd.f32 %v4417_v52, %v1184_v37  ;;  %3418 = vmatprep.subr.bf16.mxu0 %v3619_v47  ;;  %v1284_v40 = vmax.f32 %v1182_v15, 0.0 }
 0x28f   : > { %v1287_v18 = vmax.f32 %v1193_v63, 0.0 }
 0x290   : > { %v1285_v42 = vmax.f32 %v1185_v11, 0.0 }
 0x291   : > { %v1313_v35 = vpack.c.bf16 %v1287_v18, %v1286_v57  ;;  %3419 = vmatpush3.bf16.msra.mxu0 %v3619_v47 }
 0x292   : > { %v1312_v56 = vpack.c.bf16 %v1285_v42, %v1284_v40  ;;  %3420 = vmatprep.subr.bf16.mxu0 %v3620_v31 }
 0x294   : > { %3336 = vmatprep.mubr.bf16.mxu0 %v1312_v56 }
 0x295   : > { %3337 = vmatmul.mubr.bf16.gmra.mrb[40].mxu0 %v1313_v35 }
 0x296   : > { %3421 = vmatpush3.bf16.msra.mxu0 %v3620_v31 }
 0x297   : > { %3422 = vmatprep.subr.bf16.mxu0 %v3621_v5 }
 0x29a   : > { %3423 = vmatpush3.bf16.msra.mxu0 %v3621_v5 }
 0x2a2   : > { %v3294_v54 = vpop.f32.mrb[12].mxu1 }
 0x2a3   : > { %v1206_v23 = vadd.f32 %v3294_v54, %v4417_v52  ;;  %v1197_v25 = vpop.f32.mrb[13].mxu1 }
 0x2a4   : > { %v1198_v20 = vadd.f32 %v4417_v52, %v1197_v25  ;;  %v3295_v22 = vpop.f32.mrb[14].mxu1 }
 0x2a5   : > { %v1209_v44 = vadd.f32 %v3295_v22, %v4417_v52  ;;  %v1200_v24 = vpop.f32.mrb[15].mxu1  ;;  %v1290_v39 = vmax.f32 %v1206_v23, 0.0 }
 0x2a6   : > { %v1201_v4 = vadd.f32 %v4417_v52, %v1200_v24  ;;  %v1288_v48 = vmax.f32 %v1198_v20, 0.0 }
 0x2a7   : > { %v1291_v28 = vmax.f32 %v1209_v44, 0.0 }
 0x2a8   : > { %v1289_v59 = vmax.f32 %v1201_v4, 0.0 }
 0x2a9   : > { %v1315_v49 = vpack.c.bf16 %v1291_v28, %v1290_v39  ;;  %v4476_v39 = vld [vmem:[%s4777_s5 + $0x1] ss:$0 sm:$0xff] }
 0x2aa   : > { %v1314_v13 = vpack.c.bf16 %v1289_v59, %v1288_v48 }
 0x2ac   : > { %3340 = vmatprep.mubr.bf16.mxu0 %v1314_v13 }
 0x2ad   : > { %3341 = vmatmul.mubr.bf16.gmra.mrb[44].mxu0 %v1315_v49 }
 0x2ba   : > { %v3298_v12 = vpop.f32.mrb[16].mxu1 }
 0x2bb   : > { %v1222_v34 = vadd.f32 %v3298_v12, %v4417_v52  ;;  %v1213_v46 = vpop.f32.mrb[17].mxu1 }
 0x2bc   : > { %v1214_v17 = vadd.f32 %v4417_v52, %v1213_v46  ;;  %v3299_v27 = vpop.f32.mrb[18].mxu1 }
 0x2bd   : > { %v1225_v1 = vadd.f32 %v3299_v27, %v4417_v52  ;;  %v1216_v30 = vpop.f32.mrb[19].mxu1  ;;  %v1294_v58 = vmax.f32 %v1222_v34, 0.0 }
 0x2be   : > { %v1217_v33 = vadd.f32 %v4417_v52, %v1216_v30  ;;  %v1292_v36 = vmax.f32 %v1214_v17, 0.0 }
 0x2bf   : > { %v1295_v50 = vmax.f32 %v1225_v1, 0.0 }
 0x2c0   : > { %v1293_v38 = vmax.f32 %v1217_v33, 0.0 }
 0x2c1   : > { %v1317_v43 = vpack.c.bf16 %v1295_v50, %v1294_v58 }
 0x2c2   : > { %v1316_v55 = vpack.c.bf16 %v1293_v38, %v1292_v36 }
 0x2c4   : > { %3344 = vmatprep.mubr.bf16.mxu0 %v1316_v55 }
 0x2c5   : > { %3345 = vmatmul.mubr.bf16.gmra.mrb[48].mxu0 %v1317_v43 }
 0x2d2   : > { %v3302_v2 = vpop.f32.mrb[20].mxu1 }
 0x2d3   : > { %v1238_v60 = vadd.f32 %v3302_v2, %v4417_v52  ;;  %v1229_v61 = vpop.f32.mrb[21].mxu1 }
 0x2d4   : > { %v1230_v3 = vadd.f32 %v4417_v52, %v1229_v61  ;;  %v3303_v51 = vpop.f32.mrb[22].mxu1 }
 0x2d5   : > { %v1241_v29 = vadd.f32 %v3303_v51, %v4417_v52  ;;  %v1232_v16 = vpop.f32.mrb[23].mxu1  ;;  %v1298_v19 = vmax.f32 %v1238_v60, 0.0 }
 0x2d6   : > { %v1233_v53 = vadd.f32 %v4417_v52, %v1232_v16  ;;  %v1296_v6 = vmax.f32 %v1230_v3, 0.0 }
 0x2d7   : > { %v1299_v8 = vmax.f32 %v1241_v29, 0.0 }
 0x2d8   : > { %v1297_v21 = vmax.f32 %v1233_v53, 0.0 }
 0x2d9   : > { %v1319_v7 = vpack.c.bf16 %v1299_v8, %v1298_v19 }
 0x2da   : > { %v1318_v10 = vpack.c.bf16 %v1297_v21, %v1296_v6 }
 0x2dc   : > { %3348 = vmatprep.mubr.bf16.mxu0 %v1318_v10 }
 0x2dd   : > { %3349 = vmatmul.mubr.bf16.gmra.mrb[52].mxu0 %v1319_v7 }
 0x2ea   : > { %v3306_v0 = vpop.f32.mrb[24].mxu1 }
 0x2eb   : > { %v1254_v62 = vadd.f32 %v3306_v0, %v4417_v52  ;;  %v1245_v26 = vpop.f32.mrb[25].mxu1 }
 0x2ec   : > { %v1246_v41 = vadd.f32 %v4417_v52, %v1245_v26  ;;  %v3307_v45 = vpop.f32.mrb[26].mxu1 }
 0x2ed   : > { %v1257_v47 = vadd.f32 %v3307_v45, %v4417_v52  ;;  %v1248_v32 = vpop.f32.mrb[27].mxu1  ;;  %v1302_v15 = vmax.f32 %v1254_v62, 0.0 }
 0x2ee   : > { %v1249_v14 = vadd.f32 %v4417_v52, %v1248_v32  ;;  %v1300_v63 = vmax.f32 %v1246_v41, 0.0 }
 0x2ef   : > { %v1303_v9 = vmax.f32 %v1257_v47, 0.0 }
 0x2f0   : > { %v1301_v37 = vmax.f32 %v1249_v14, 0.0 }
 0x2f1   : > { %v1321_v11 = vpack.c.bf16 %v1303_v9, %v1302_v15 }
 0x2f2   : > { %v1320_v31 = vpack.c.bf16 %v1301_v37, %v1300_v63 }
 0x2f4   : > { %3352 = vmatprep.mubr.bf16.mxu0 %v1320_v31 }
 0x2f5   : > { %3353 = vmatmul.mubr.bf16.gmra.mrb[56].mxu0 %v1321_v11 }
 0x302   : > { %v3310_v57 = vpop.f32.mrb[28].mxu1 }
 0x303   : > { %v1270_v18 = vadd.f32 %v3310_v57, %v4417_v52  ;;  %v1261_v40 = vpop.f32.mrb[29].mxu1 }
 0x304   : > { %v1262_v42 = vadd.f32 %v4417_v52, %v1261_v40  ;;  %v3311_v35 = vpop.f32.mrb[30].mxu1 }
 0x305   : > { %v1273_v56 = vadd.f32 %v3311_v35, %v4417_v52  ;;  %v1264_v5 = vpop.f32.mrb[31].mxu1  ;;  %v1306_v23 = vmax.f32 %v1270_v18, 0.0 }
 0x306   : > { %v1265_v54 = vadd.f32 %v4417_v52, %v1264_v5  ;;  %v1304_v20 = vmax.f32 %v1262_v42, 0.0 }
 0x307   : > { %v1307_v25 = vmax.f32 %v1273_v56, 0.0 }
 0x308   : > { %v1305_v22 = vmax.f32 %v1265_v54, 0.0 }
 0x309   : > { %v1323_v44 = vpack.c.bf16 %v1307_v25, %v1306_v23 }
 0x30a   : > { %v1322_v24 = vpack.c.bf16 %v1305_v22, %v1304_v20  ;;  %v3378_v4 = vpop.f32.mrb[32].mxu1 }
 0x30b   : > { %v2190_v28 = vadd.f32 %v4476_v39, %v3378_v4  ;;  %v2181_v48 = vpop.f32.mrb[33].mxu1 }
 0x30c   : > { %v2182_v59 = vadd.f32 %v4476_v39, %v2181_v48  ;;  %3356 = vmatprep.mubr.bf16.mxu0 %v1322_v24  ;;  %v3379_v49 = vpop.f32.mrb[34].mxu1 }
 0x30d   : > { %v2193_v13 = vadd.f32 %v4476_v39, %v3379_v49  ;;  %3357 = vmatmul.mubr.bf16.gmra.mrb[60].mxu0 %v1323_v44  ;;  %v2184_v12 = vpop.f32.mrb[35].mxu1  ;;  %v2310_v46 = vmax.f32 %v2190_v28, 0.0 }
 0x30e   : > { %v2185_v34 = vadd.f32 %v4476_v39, %v2184_v12  ;;  %v2308_v27 = vmax.f32 %v2182_v59, 0.0 }
 0x30f   : > { %v2311_v17 = vmax.f32 %v2193_v13, 0.0 }
 0x310   : > { %v2309_v1 = vmax.f32 %v2185_v34, 0.0 }
 0x311   : > { %v2341_v30 = vpack.c.bf16 %v2311_v17, %v2310_v46 }
 0x312   : > { %v2340_v33 = vpack.c.bf16 %v2309_v1, %v2308_v27  ;;  %v3382_v58 = vpop.f32.mrb[36].mxu1 }
 0x313   : > { %v2206_v50 = vadd.f32 %v4476_v39, %v3382_v58  ;;  %v2197_v36 = vpop.f32.mrb[37].mxu1 }
 0x314   : > { %v2198_v38 = vadd.f32 %v4476_v39, %v2197_v36  ;;  %v3383_v43 = vpop.f32.mrb[38].mxu1  ;;  %3424 = vmatprep.mubr.bf16.mxu0 %v2340_v33 }
 0x315   : > { %v2209_v55 = vadd.f32 %v4476_v39, %v3383_v43  ;;  %v2200_v2 = vpop.f32.mrb[39].mxu1  ;;  %3425 = vmatmul.mubr.bf16.vlgmr.msra.gmra.mrb[64].mxu0 %v2341_v30  ;;  %v2314_v61 = vmax.f32 %v2206_v50, 0.0  ;;  %v3622_v50 = vld [vmem:[%s4776_s4] sm:$0xff]  }
 0x316   : > { %v2201_v60 = vadd.f32 %v4476_v39, %v2200_v2  ;;  %v2312_v51 = vmax.f32 %v2198_v38, 0.0  ;;  %v3623_v38 = vld [vmem:[%s4776_s4 + $0x8] sm:$0xff]   ;;  %3456 = vmatprep.subr.bf16.mxu1 %v3622_v50 }
 0x317   : > { %v2315_v3 = vmax.f32 %v2209_v55, 0.0  ;;  %3457 = vmatpush3.bf16.msra.mxu1 %v3622_v50 }
 0x318   : > { %v2313_v29 = vmax.f32 %v2201_v60, 0.0  ;;  %3458 = vmatprep.subr.bf16.mxu1 %v3623_v38 }
 0x319   : > { %v2343_v16 = vpack.c.bf16 %v2315_v3, %v2314_v61  ;;  %v3624_v3 = vld [vmem:[%s4776_s4 + $0x10] sm:$0xff]  }
 0x31a   : > { %v2342_v53 = vpack.c.bf16 %v2313_v29, %v2312_v51  ;;  %v3386_v19 = vpop.f32.mrb[40].mxu1 }
 0x31b   : > { %v2222_v8 = vadd.f32 %v4476_v39, %v3386_v19  ;;  %v2213_v6 = vpop.f32.mrb[41].mxu1  ;;  %3459 = vmatpush3.bf16.msra.mxu1 %v3623_v38 }
 0x31c   : > { %v2214_v21 = vadd.f32 %v4476_v39, %v2213_v6  ;;  %v3387_v7 = vpop.f32.mrb[42].mxu1  ;;  %3428 = vmatprep.mubr.bf16.mxu0 %v2342_v53  ;;  %3460 = vmatprep.subr.bf16.mxu1 %v3624_v3 }
 0x31d   : > { %v2225_v10 = vadd.f32 %v4476_v39, %v3387_v7  ;;  %v2216_v0 = vpop.f32.mrb[43].mxu1  ;;  %3429 = vmatmul.mubr.bf16.gmra.mrb[68].mxu0 %v2343_v16  ;;  %v2318_v26 = vmax.f32 %v2222_v8, 0.0 }
 0x31e   : > { %v2217_v62 = vadd.f32 %v4476_v39, %v2216_v0  ;;  %v2316_v45 = vmax.f32 %v2214_v21, 0.0 }
 0x31f   : > { %v2319_v41 = vmax.f32 %v2225_v10, 0.0  ;;  %3461 = vmatpush3.bf16.msra.mxu1 %v3624_v3 }
 0x320   : > { %v2317_v47 = vmax.f32 %v2217_v62, 0.0 }
 0x321   : > { %v2345_v32 = vpack.c.bf16 %v2319_v41, %v2318_v26 }
 0x322   : > { %v2344_v14 = vpack.c.bf16 %v2317_v47, %v2316_v45  ;;  %v3390_v15 = vpop.f32.mrb[44].mxu1 }
 0x323   : > { %v2238_v9 = vadd.f32 %v4476_v39, %v3390_v15  ;;  %v2229_v63 = vpop.f32.mrb[45].mxu1 }
 0x324   : > { %v2230_v37 = vadd.f32 %v4476_v39, %v2229_v63  ;;  %v3391_v11 = vpop.f32.mrb[46].mxu1  ;;  %3432 = vmatprep.mubr.bf16.mxu0 %v2344_v14 }
 0x325   : > { %v2241_v31 = vadd.f32 %v4476_v39, %v3391_v11  ;;  %v2232_v57 = vpop.f32.mrb[47].mxu1  ;;  %3433 = vmatmul.mubr.bf16.gmra.mrb[72].mxu0 %v2345_v32  ;;  %v2322_v40 = vmax.f32 %v2238_v9, 0.0 }
 0x326   : > { %v2233_v18 = vadd.f32 %v4476_v39, %v2232_v57  ;;  %v2320_v35 = vmax.f32 %v2230_v37, 0.0 }
 0x327   : > { %v2323_v42 = vmax.f32 %v2241_v31, 0.0 }
 0x328   : > { %v2321_v56 = vmax.f32 %v2233_v18, 0.0 }
 0x329   : > { %v2347_v5 = vpack.c.bf16 %v2323_v42, %v2322_v40 }
 0x32a   : > { %v2346_v54 = vpack.c.bf16 %v2321_v56, %v2320_v35  ;;  %v3394_v23 = vpop.f32.mrb[48].mxu1  ;;  %v4522_v56 = vld [vmem:[%s4777_s5 + $0x3] ss:$0 sm:$0xff] }
 0x32b   : > { %v2254_v25 = vadd.f32 %v4476_v39, %v3394_v23  ;;  %v2245_v20 = vpop.f32.mrb[49].mxu1 }
 0x32c   : > { %v2246_v22 = vadd.f32 %v4476_v39, %v2245_v20  ;;  %v3395_v44 = vpop.f32.mrb[50].mxu1  ;;  %3436 = vmatprep.mubr.bf16.mxu0 %v2346_v54 }
 0x32d   : > { %v2257_v24 = vadd.f32 %v4476_v39, %v3395_v44  ;;  %v2248_v4 = vpop.f32.mrb[51].mxu1  ;;  %3437 = vmatmul.mubr.bf16.gmra.mrb[76].mxu0 %v2347_v5  ;;  %v2326_v48 = vmax.f32 %v2254_v25, 0.0  ;;  %v3625_v5 = vld [vmem:[%s4776_s4 + $0x18] sm:$0xff]   ;;  %v3627_v44 = vld [vmem:[%s4776_s4 + $0x28] sm:$0xff]  }
 0x32e   : > { %v2249_v28 = vadd.f32 %v4476_v39, %v2248_v4  ;;  %v2324_v49 = vmax.f32 %v2246_v22, 0.0  ;;  %3462 = vmatprep.subr.bf16.mxu1 %v3625_v5 }
 0x32f   : > { %v2327_v59 = vmax.f32 %v2257_v24, 0.0  ;;  %3463 = vmatpush3.bf16.msra.mxu1 %v3625_v5 }
 0x330   : > { %v2325_v13 = vmax.f32 %v2249_v28, 0.0 }
 0x331   : > { %v2349_v12 = vpack.c.bf16 %v2327_v59, %v2326_v48 }
 0x332   : > { %v2348_v34 = vpack.c.bf16 %v2325_v13, %v2324_v49  ;;  %v3398_v46 = vpop.f32.mrb[52].mxu1 }
 0x333   : > { %v2270_v17 = vadd.f32 %v4476_v39, %v3398_v46  ;;  %v2261_v27 = vpop.f32.mrb[53].mxu1 }
 0x334   : > { %v2262_v1 = vadd.f32 %v4476_v39, %v2261_v27  ;;  %v3399_v30 = vpop.f32.mrb[54].mxu1  ;;  %3440 = vmatprep.mubr.bf16.mxu0 %v2348_v34  ;;  %v3628_v27 = vld [vmem:[%s4776_s4 + $0x30] sm:$0xff]  }
 0x335   : > { %v2273_v33 = vadd.f32 %v4476_v39, %v3399_v30  ;;  %v2264_v58 = vpop.f32.mrb[55].mxu1  ;;  %3441 = vmatmul.mubr.bf16.gmra.mrb[80].mxu0 %v2349_v12  ;;  %v2330_v43 = vmax.f32 %v2270_v17, 0.0 }
 0x336   : > { %v2265_v36 = vadd.f32 %v4476_v39, %v2264_v58  ;;  %v2328_v2 = vmax.f32 %v2262_v1, 0.0 }
 0x337   : > { %v2331_v55 = vmax.f32 %v2273_v33, 0.0 }
 0x338   : > { %v2329_v60 = vmax.f32 %v2265_v36, 0.0 }
 0x339   : > { %v2351_v61 = vpack.c.bf16 %v2331_v55, %v2330_v43  ;;  %v3629_v55 = vld [vmem:[%s4776_s4 + $0x38] sm:$0xff]  }
 0x33a   : > { %v2350_v51 = vpack.c.bf16 %v2329_v60, %v2328_v2  ;;  %v3402_v29 = vpop.f32.mrb[56].mxu1 }
 0x33b   : > { %v2286_v16 = vadd.f32 %v4476_v39, %v3402_v29  ;;  %v2277_v53 = vpop.f32.mrb[57].mxu1 }
 0x33c   : > { %v2278_v19 = vadd.f32 %v4476_v39, %v2277_v53  ;;  %v3403_v8 = vpop.f32.mrb[58].mxu1  ;;  %3444 = vmatprep.mubr.bf16.mxu0 %v2350_v51 }
 0x33d   : > { %v2289_v6 = vadd.f32 %v4476_v39, %v3403_v8  ;;  %v2280_v21 = vpop.f32.mrb[59].mxu1  ;;  %3445 = vmatmul.mubr.bf16.gmra.mrb[84].mxu0 %v2351_v61  ;;  %v2334_v10 = vmax.f32 %v2286_v16, 0.0 }
 0x33e   : > { %v2281_v7 = vadd.f32 %v4476_v39, %v2280_v21  ;;  %v2332_v62 = vmax.f32 %v2278_v19, 0.0 }
 0x33f   : > { %v2335_v0 = vmax.f32 %v2289_v6, 0.0 }
 0x340   : > { %v2333_v26 = vmax.f32 %v2281_v7, 0.0 }
 0x341   : > { %v2353_v41 = vpack.c.bf16 %v2335_v0, %v2334_v10 }
 0x342   : > { %v2352_v45 = vpack.c.bf16 %v2333_v26, %v2332_v62  ;;  %v3406_v47 = vpop.f32.mrb[60].mxu1 }
 0x343   : > { %v2302_v32 = vadd.f32 %v4476_v39, %v3406_v47  ;;  %v2293_v14 = vpop.f32.mrb[61].mxu1 }
 0x344   : > { %v2294_v15 = vadd.f32 %v4476_v39, %v2293_v14  ;;  %v3407_v9 = vpop.f32.mrb[62].mxu1  ;;  %3448 = vmatprep.mubr.bf16.mxu0 %v2352_v45 }
 0x345   : > { %v2305_v63 = vadd.f32 %v4476_v39, %v3407_v9  ;;  %v2296_v37 = vpop.f32.mrb[63].mxu1  ;;  %3449 = vmatmul.mubr.bf16.gmra.mrb[88].mxu0 %v2353_v41  ;;  %v2338_v31 = vmax.f32 %v2302_v32, 0.0 }
 0x346   : > { %v2297_v11 = vadd.f32 %v4476_v39, %v2296_v37  ;;  %v2336_v18 = vmax.f32 %v2294_v15, 0.0  ;;  %v3626_v39 = vld [vmem:[%s4776_s4 + $0x20] sm:$0xff]  }
 0x347   : > { %v2339_v57 = vmax.f32 %v2305_v63, 0.0  ;;  %3464 = vmatprep.subr.bf16.mxu1 %v3626_v39 }
 0x348   : > { %v2337_v40 = vmax.f32 %v2297_v11, 0.0  ;;  %3465 = vmatpush3.bf16.msra.mxu1 %v3626_v39 }
 0x349   : > { %v2355_v42 = vpack.c.bf16 %v2339_v57, %v2338_v31  ;;  %3466 = vmatprep.subr.bf16.mxu1 %v3627_v44 }
 0x34a   : > { %v2354_v35 = vpack.c.bf16 %v2337_v40, %v2336_v18 }
 0x34c   : > { %3452 = vmatprep.mubr.bf16.mxu0 %v2354_v35  ;;  %3467 = vmatpush3.bf16.msra.mxu1 %v3627_v44 }
 0x34d   : > { %3453 = vmatmul.mubr.bf16.gmra.mrb[92].mxu0 %v2355_v42  ;;  %3468 = vmatprep.subr.bf16.mxu1 %v3628_v27 }
 0x34f   : > { %v3330_v54 = vpop.f32.mrb[32].mxu0 }
 0x350   : > { %v1435_v23 = vadd.f32 %v3330_v54, %v4522_v56  ;;  %v1426_v25 = vpop.f32.mrb[33].mxu0  ;;  %3469 = vmatpush3.bf16.msra.mxu1 %v3628_v27 }
 0x351   : > { %v1427_v20 = vadd.f32 %v4522_v56, %v1426_v25  ;;  %v3331_v22 = vpop.f32.mrb[34].mxu0  ;;  %3470 = vmatprep.subr.bf16.mxu1 %v3629_v55 }
 0x352   : > { %1556 = vst.msk [vmem:[%s4535_s12 + $0x10] sm:$0xff] %vm1553_vm0, %v1435_v23  ;;  %v1438_v24 = vadd.f32 %v3331_v22, %v4522_v56  ;;  %v1429_v4 = vpop.f32.mrb[35].mxu0 }
 0x353   : > { %1554 = vst.msk [vmem:[%s4535_s12] sm:$0xff] %vm1553_vm0, %v1427_v20  ;;  %v1430_v28 = vadd.f32 %v4522_v56, %v1429_v4 }
 0x354   : > { %1557 = vst.msk [vmem:[%s4535_s12 + $0x18] sm:$0xff] %vm1553_vm0, %v1438_v24  ;;  %3471 = vmatpush3.bf16.msra.mxu1 %v3629_v55 }
 0x355   : > { %1555 = vst.msk [vmem:[%s4535_s12 + $0x8] sm:$0xff] %vm1553_vm0, %v1430_v28 }
 0x357   : > { %v3334_v48 = vpop.f32.mrb[36].mxu0 }
 0x358   : > { %v1451_v59 = vadd.f32 %v3334_v48, %v4522_v56  ;;  %v1442_v49 = vpop.f32.mrb[37].mxu0 }
 0x359   : > { %v1443_v13 = vadd.f32 %v4522_v56, %v1442_v49  ;;  %v3335_v12 = vpop.f32.mrb[38].mxu0 }
 0x35a   : > { %1560 = vst.msk [vmem:[%s4535_s12 + $0x30] sm:$0xff] %vm1553_vm0, %v1451_v59  ;;  %v1454_v34 = vadd.f32 %v3335_v12, %v4522_v56  ;;  %v1445_v46 = vpop.f32.mrb[39].mxu0 }
 0x35b   : > { %1558 = vst.msk [vmem:[%s4535_s12 + $0x20] sm:$0xff] %vm1553_vm0, %v1443_v13  ;;  %v1446_v17 = vadd.f32 %v4522_v56, %v1445_v46 }
 0x35c   : > { %1561 = vst.msk [vmem:[%s4535_s12 + $0x38] sm:$0xff] %vm1553_vm0, %v1454_v34 }
 0x35d   : > { %1559 = vst.msk [vmem:[%s4535_s12 + $0x28] sm:$0xff] %vm1553_vm0, %v1446_v17 }
 0x368   : > { %v3338_v1 = vpop.f32.mrb[40].mxu0 }
 0x369   : > { %v1467_v30 = vadd.f32 %v3338_v1, %v4522_v56  ;;  %v1458_v33 = vpop.f32.mrb[41].mxu0 }
 0x36a   : > { %v1459_v58 = vadd.f32 %v4522_v56, %v1458_v33  ;;  %v3339_v50 = vpop.f32.mrb[42].mxu0 }
 0x36b   : > { %1564 = vst.msk [vmem:[%s4535_s12 + $0x50] sm:$0xff] %vm1553_vm0, %v1467_v30  ;;  %v1470_v36 = vadd.f32 %v3339_v50, %v4522_v56  ;;  %v1461_v38 = vpop.f32.mrb[43].mxu0 }
 0x36c   : > { %1562 = vst.msk [vmem:[%s4535_s12 + $0x40] sm:$0xff] %vm1553_vm0, %v1459_v58  ;;  %v1462_v43 = vadd.f32 %v4522_v56, %v1461_v38 }
 0x36d   : > { %1565 = vst.msk [vmem:[%s4535_s12 + $0x58] sm:$0xff] %vm1553_vm0, %v1470_v36 }
 0x36e   : > { %1563 = vst.msk [vmem:[%s4535_s12 + $0x48] sm:$0xff] %vm1553_vm0, %v1462_v43 }
 0x380   : > { %v3342_v2 = vpop.f32.mrb[44].mxu0 }
 0x381   : > { %v1483_v60 = vadd.f32 %v3342_v2, %v4522_v56  ;;  %v1474_v61 = vpop.f32.mrb[45].mxu0 }
 0x382   : > { %v1475_v3 = vadd.f32 %v4522_v56, %v1474_v61  ;;  %v3343_v51 = vpop.f32.mrb[46].mxu0 }
 0x383   : > { %1568 = vst.msk [vmem:[%s4535_s12 + $0x70] sm:$0xff] %vm1553_vm0, %v1483_v60  ;;  %v1486_v29 = vadd.f32 %v3343_v51, %v4522_v56  ;;  %v1477_v16 = vpop.f32.mrb[47].mxu0 }
 0x384   : > { %1566 = vst.msk [vmem:[%s4535_s12 + $0x60] sm:$0xff] %vm1553_vm0, %v1475_v3  ;;  %v1478_v53 = vadd.f32 %v4522_v56, %v1477_v16 }
 0x385   : > { %1569 = vst.msk [vmem:[%s4535_s12 + $0x78] sm:$0xff] %vm1553_vm0, %v1486_v29 }
 0x386   : > { %1567 = vst.msk [vmem:[%s4535_s12 + $0x68] sm:$0xff] %vm1553_vm0, %v1478_v53 }
 0x398   : > { %v3346_v19 = vpop.f32.mrb[48].mxu0 }
 0x399   : > { %v1499_v8 = vadd.f32 %v3346_v19, %v4522_v56  ;;  %v1490_v6 = vpop.f32.mrb[49].mxu0 }
 0x39a   : > { %v1491_v21 = vadd.f32 %v4522_v56, %v1490_v6  ;;  %v3347_v7 = vpop.f32.mrb[50].mxu0 }
 0x39b   : > { %1572 = vst.msk [vmem:[%s4535_s12 + $0x90] sm:$0xff] %vm1553_vm0, %v1499_v8  ;;  %v1502_v10 = vadd.f32 %v3347_v7, %v4522_v56  ;;  %v1493_v0 = vpop.f32.mrb[51].mxu0 }
 0x39c   : > { %1570 = vst.msk [vmem:[%s4535_s12 + $0x80] sm:$0xff] %vm1553_vm0, %v1491_v21  ;;  %v1494_v62 = vadd.f32 %v4522_v56, %v1493_v0 }
 0x39d   : > { %1573 = vst.msk [vmem:[%s4535_s12 + $0x98] sm:$0xff] %vm1553_vm0, %v1502_v10 }
 0x39e   : > { %1571 = vst.msk [vmem:[%s4535_s12 + $0x88] sm:$0xff] %vm1553_vm0, %v1494_v62 }
 0x3b0   : > { %v3350_v26 = vpop.f32.mrb[52].mxu0 }
 0x3b1   : > { %v1515_v41 = vadd.f32 %v3350_v26, %v4522_v56  ;;  %v1506_v45 = vpop.f32.mrb[53].mxu0 }
 0x3b2   : > { %v1507_v47 = vadd.f32 %v4522_v56, %v1506_v45  ;;  %v3351_v32 = vpop.f32.mrb[54].mxu0 }
 0x3b3   : > { %1576 = vst.msk [vmem:[%s4535_s12 + $0xb0] sm:$0xff] %vm1553_vm0, %v1515_v41  ;;  %v1518_v14 = vadd.f32 %v3351_v32, %v4522_v56  ;;  %v1509_v15 = vpop.f32.mrb[55].mxu0 }
 0x3b4   : > { %1574 = vst.msk [vmem:[%s4535_s12 + $0xa0] sm:$0xff] %vm1553_vm0, %v1507_v47  ;;  %v1510_v9 = vadd.f32 %v4522_v56, %v1509_v15 }
 0x3b5   : > { %1577 = vst.msk [vmem:[%s4535_s12 + $0xb8] sm:$0xff] %vm1553_vm0, %v1518_v14 }
 0x3b6   : > { %1575 = vst.msk [vmem:[%s4535_s12 + $0xa8] sm:$0xff] %vm1553_vm0, %v1510_v9 }
 0x3c8   : > { %v3354_v63 = vpop.f32.mrb[56].mxu0 }
 0x3c9   : > { %v1531_v37 = vadd.f32 %v3354_v63, %v4522_v56  ;;  %v1522_v11 = vpop.f32.mrb[57].mxu0 }
 0x3ca   : > { %v1523_v31 = vadd.f32 %v4522_v56, %v1522_v11  ;;  %v3355_v57 = vpop.f32.mrb[58].mxu0 }
 0x3cb   : > { %1580 = vst.msk [vmem:[%s4535_s12 + $0xd0] sm:$0xff] %vm1553_vm0, %v1531_v37  ;;  %v1534_v18 = vadd.f32 %v3355_v57, %v4522_v56  ;;  %v1525_v40 = vpop.f32.mrb[59].mxu0 }
 0x3cc   : > { %1578 = vst.msk [vmem:[%s4535_s12 + $0xc0] sm:$0xff] %vm1553_vm0, %v1523_v31  ;;  %v1526_v42 = vadd.f32 %v4522_v56, %v1525_v40 }
 0x3cd   : > { %1581 = vst.msk [vmem:[%s4535_s12 + $0xd8] sm:$0xff] %vm1553_vm0, %v1534_v18 }
 0x3ce   : > { %1579 = vst.msk [vmem:[%s4535_s12 + $0xc8] sm:$0xff] %vm1553_vm0, %v1526_v42 }
 0x3e0   : > { %v3358_v35 = vpop.f32.mrb[60].mxu0 }
 0x3e1   : > { %v1547_v5 = vadd.f32 %v3358_v35, %v4522_v56  ;;  %v1538_v39 = vpop.f32.mrb[61].mxu0 }
 0x3e2   : > { %v1539_v54 = vadd.f32 %v4522_v56, %v1538_v39  ;;  %v3359_v23 = vpop.f32.mrb[62].mxu0 }
 0x3e3   : > { %1584 = vst.msk [vmem:[%s4535_s12 + $0xf0] sm:$0xff] %vm1553_vm0, %v1547_v5  ;;  %v1550_v25 = vadd.f32 %v3359_v23, %v4522_v56  ;;  %v1541_v20 = vpop.f32.mrb[63].mxu0 }
 0x3e4   : > { %1582 = vst.msk [vmem:[%s4535_s12 + $0xe0] sm:$0xff] %vm1553_vm0, %v1539_v54  ;;  %v1542_v22 = vadd.f32 %v4522_v56, %v1541_v20 }
 0x3e5   : > { %1585 = vst.msk [vmem:[%s4535_s12 + $0xf8] sm:$0xff] %vm1553_vm0, %v1550_v25 }
 0x3e6   : > { %1583 = vst.msk [vmem:[%s4535_s12 + $0xe8] sm:$0xff] %vm1553_vm0, %v1542_v22 }
 0x3e8   : > { %v3426_v44 = vpop.f32.mrb[64].mxu0 }
 0x3e9   : > { %v2463_v24 = vadd.f32 %v3426_v44, %v4417_v52  ;;  %v2454_v4 = vpop.f32.mrb[65].mxu0 }
 0x3ea   : > { %v2455_v28 = vadd.f32 %v4417_v52, %v2454_v4  ;;  %v3427_v48 = vpop.f32.mrb[66].mxu0 }
 0x3eb   : > { %v2466_v59 = vadd.f32 %v3427_v48, %v4417_v52  ;;  %v2457_v49 = vpop.f32.mrb[67].mxu0  ;;  %v2583_v12 = vmax.f32 %v2463_v24, 0.0 }
 0x3ec   : > { %v2458_v13 = vadd.f32 %v4417_v52, %v2457_v49  ;;  %v2581_v46 = vmax.f32 %v2455_v28, 0.0 }
 0x3ed   : > { %v2584_v34 = vmax.f32 %v2466_v59, 0.0 }
 0x3ee   : > { %v2582_v17 = vmax.f32 %v2458_v13, 0.0 }
 0x3ef   : > { %v2614_v27 = vpack.c.bf16 %v2584_v34, %v2583_v12 }
 0x3f0   : > { %v2613_v1 = vpack.c.bf16 %v2582_v17, %v2581_v46  ;;  %v3430_v30 = vpop.f32.mrb[68].mxu0 }
 0x3f1   : > { %v2479_v33 = vadd.f32 %v3430_v30, %v4417_v52  ;;  %v2470_v58 = vpop.f32.mrb[69].mxu0 }
 0x3f2   : > { %v2471_v50 = vadd.f32 %v4417_v52, %v2470_v58  ;;  %v3431_v36 = vpop.f32.mrb[70].mxu0  ;;  %3472 = vmatprep.mubr.bf16.mxu1 %v2613_v1 }
 0x3f3   : > { %v2482_v38 = vadd.f32 %v3431_v36, %v4417_v52  ;;  %v2473_v43 = vpop.f32.mrb[71].mxu0  ;;  %3473 = vmatmul.mubr.bf16.vlgmr.msra.gmra.mrb[64].mxu1 %v2614_v27  ;;  %v2587_v2 = vmax.f32 %v2479_v33, 0.0 }
 0x3f4   : > { %v2474_v55 = vadd.f32 %v4417_v52, %v2473_v43  ;;  %v2585_v61 = vmax.f32 %v2471_v50, 0.0 }
 0x3f5   : > { %v2588_v60 = vmax.f32 %v2482_v38, 0.0 }
 0x3f6   : > { %v2586_v3 = vmax.f32 %v2474_v55, 0.0 }
 0x3f7   : > { %v2616_v51 = vpack.c.bf16 %v2588_v60, %v2587_v2 }
 0x3f8   : > { %v2615_v29 = vpack.c.bf16 %v2586_v3, %v2585_v61  ;;  %v3434_v16 = vpop.f32.mrb[72].mxu0 }
 0x3f9   : > { %v2495_v53 = vadd.f32 %v3434_v16, %v4417_v52  ;;  %v2486_v19 = vpop.f32.mrb[73].mxu0 }
 0x3fa   : > { %v2487_v8 = vadd.f32 %v4417_v52, %v2486_v19  ;;  %v3435_v6 = vpop.f32.mrb[74].mxu0  ;;  %3476 = vmatprep.mubr.bf16.mxu1 %v2615_v29 }
 0x3fb   : > { %v2498_v21 = vadd.f32 %v3435_v6, %v4417_v52  ;;  %v2489_v7 = vpop.f32.mrb[75].mxu0  ;;  %3477 = vmatmul.mubr.bf16.gmra.mrb[68].mxu1 %v2616_v51  ;;  %v2591_v0 = vmax.f32 %v2495_v53, 0.0 }
 0x3fc   : > { %v2490_v10 = vadd.f32 %v4417_v52, %v2489_v7  ;;  %v2589_v26 = vmax.f32 %v2487_v8, 0.0 }
 0x3fd   : > { %v2592_v62 = vmax.f32 %v2498_v21, 0.0 }
 0x3fe   : > { %v2590_v41 = vmax.f32 %v2490_v10, 0.0 }
 0x3ff   : > { %v2618_v45 = vpack.c.bf16 %v2592_v62, %v2591_v0  ;;  %v3634_v62 = vld [vmem:[%s4777_s5 + $0x2] ss:$0 sm:$0xff] }
 0x400   : > { %v2617_v47 = vpack.c.bf16 %v2590_v41, %v2589_v26  ;;  %v3438_v32 = vpop.f32.mrb[76].mxu0 }
 0x401   : > { %v2511_v14 = vadd.f32 %v3438_v32, %v4417_v52  ;;  %v2502_v15 = vpop.f32.mrb[77].mxu0 }
 0x402   : > { %v2503_v9 = vadd.f32 %v4417_v52, %v2502_v15  ;;  %v3439_v63 = vpop.f32.mrb[78].mxu0  ;;  %3480 = vmatprep.mubr.bf16.mxu1 %v2617_v47 }
 0x403   : > { %v2514_v37 = vadd.f32 %v3439_v63, %v4417_v52  ;;  %v2505_v11 = vpop.f32.mrb[79].mxu0  ;;  %3481 = vmatmul.mubr.bf16.gmra.mrb[72].mxu1 %v2618_v45  ;;  %v2595_v57 = vmax.f32 %v2511_v14, 0.0 }
 0x404   : > { %v2506_v31 = vadd.f32 %v4417_v52, %v2505_v11  ;;  %v2593_v40 = vmax.f32 %v2503_v9, 0.0 }
 0x405   : > { %v2596_v18 = vmax.f32 %v2514_v37, 0.0 }
 0x406   : > { %v2594_v42 = vmax.f32 %v2506_v31, 0.0 }
 0x407   : > { %v2620_v35 = vpack.c.bf16 %v2596_v18, %v2595_v57 }
 0x408   : > { %v2619_v5 = vpack.c.bf16 %v2594_v42, %v2593_v40  ;;  %v3442_v39 = vpop.f32.mrb[80].mxu0 }
 0x409   : > { %v2527_v54 = vadd.f32 %v3442_v39, %v4417_v52  ;;  %v2518_v23 = vpop.f32.mrb[81].mxu0 }
 0x40a   : > { %v2519_v25 = vadd.f32 %v4417_v52, %v2518_v23  ;;  %v3443_v20 = vpop.f32.mrb[82].mxu0  ;;  %3484 = vmatprep.mubr.bf16.mxu1 %v2619_v5 }
 0x40b   : > { %v2530_v22 = vadd.f32 %v3443_v20, %v4417_v52  ;;  %v2521_v44 = vpop.f32.mrb[83].mxu0  ;;  %3485 = vmatmul.mubr.bf16.gmra.mrb[76].mxu1 %v2620_v35  ;;  %v2599_v4 = vmax.f32 %v2527_v54, 0.0 }
 0x40c   : > { %v2522_v24 = vadd.f32 %v4417_v52, %v2521_v44  ;;  %v2597_v48 = vmax.f32 %v2519_v25, 0.0 }
 0x40d   : > { %v2600_v28 = vmax.f32 %v2530_v22, 0.0 }
 0x40e   : > { %v2598_v59 = vmax.f32 %v2522_v24, 0.0 }
 0x40f   : > { %v2622_v49 = vpack.c.bf16 %v2600_v28, %v2599_v4 }
 0x410   : > { %v2621_v13 = vpack.c.bf16 %v2598_v59, %v2597_v48  ;;  %v3446_v12 = vpop.f32.mrb[84].mxu0 }
 0x411   : > { %v2543_v34 = vadd.f32 %v3446_v12, %v4417_v52  ;;  %v2534_v46 = vpop.f32.mrb[85].mxu0 }
 0x412   : > { %v2535_v17 = vadd.f32 %v4417_v52, %v2534_v46  ;;  %v3447_v27 = vpop.f32.mrb[86].mxu0  ;;  %3488 = vmatprep.mubr.bf16.mxu1 %v2621_v13 }
 0x413   : > { %v2546_v1 = vadd.f32 %v3447_v27, %v4417_v52  ;;  %v2537_v30 = vpop.f32.mrb[87].mxu0  ;;  %3489 = vmatmul.mubr.bf16.gmra.mrb[80].mxu1 %v2622_v49  ;;  %v2603_v58 = vmax.f32 %v2543_v34, 0.0 }
 0x414   : > { %v2538_v33 = vadd.f32 %v4417_v52, %v2537_v30  ;;  %v2601_v36 = vmax.f32 %v2535_v17, 0.0 }
 0x415   : > { %v2604_v50 = vmax.f32 %v2546_v1, 0.0 }
 0x416   : > { %v2602_v38 = vmax.f32 %v2538_v33, 0.0 }
 0x417   : > { %v2624_v43 = vpack.c.bf16 %v2604_v50, %v2603_v58 }
 0x418   : > { %v2623_v55 = vpack.c.bf16 %v2602_v38, %v2601_v36  ;;  %v3450_v2 = vpop.f32.mrb[88].mxu0 }
 0x419   : > { %v2559_v60 = vadd.f32 %v3450_v2, %v4417_v52  ;;  %v2550_v61 = vpop.f32.mrb[89].mxu0 }
 0x41a   : > { %v2551_v3 = vadd.f32 %v4417_v52, %v2550_v61  ;;  %v3451_v51 = vpop.f32.mrb[90].mxu0  ;;  %3492 = vmatprep.mubr.bf16.mxu1 %v2623_v55 }
 0x41b   : > { %v2562_v29 = vadd.f32 %v3451_v51, %v4417_v52  ;;  %v2553_v16 = vpop.f32.mrb[91].mxu0  ;;  %3493 = vmatmul.mubr.bf16.gmra.mrb[84].mxu1 %v2624_v43  ;;  %v2607_v19 = vmax.f32 %v2559_v60, 0.0 }
 0x41c   : > { %v2554_v53 = vadd.f32 %v4417_v52, %v2553_v16  ;;  %v2605_v6 = vmax.f32 %v2551_v3, 0.0 }
 0x41d   : > { %v2608_v8 = vmax.f32 %v2562_v29, 0.0 }
 0x41e   : > { %v2606_v21 = vmax.f32 %v2554_v53, 0.0 }
 0x41f   : > { %v2626_v7 = vpack.c.bf16 %v2608_v8, %v2607_v19 }
 0x420   : > { %v2625_v10 = vpack.c.bf16 %v2606_v21, %v2605_v6  ;;  %v3454_v0 = vpop.f32.mrb[92].mxu0 }
 0x421   : > { %v2575_v26 = vadd.f32 %v3634_v62, %v3454_v0  ;;  %v2566_v41 = vpop.f32.mrb[93].mxu0 }
 0x422   : > { %v2567_v45 = vadd.f32 %v3634_v62, %v2566_v41  ;;  %v3455_v47 = vpop.f32.mrb[94].mxu0  ;;  %3496 = vmatprep.mubr.bf16.mxu1 %v2625_v10 }
 0x423   : > { %v2578_v32 = vadd.f32 %v3634_v62, %v3455_v47  ;;  %v2569_v14 = vpop.f32.mrb[95].mxu0  ;;  %3497 = vmatmul.mubr.bf16.gmra.mrb[88].mxu1 %v2626_v7  ;;  %v2611_v15 = vmax.f32 %v2575_v26, 0.0 }
 0x424   : > { %v2570_v52 = vadd.f32 %v3634_v62, %v2569_v14  ;;  %v2609_v63 = vmax.f32 %v2567_v45, 0.0 }
 0x425   : > { %v2612_v9 = vmax.f32 %v2578_v32, 0.0 }
 0x426   : > { %v2610_v37 = vmax.f32 %v2570_v52, 0.0 }
 0x427   : > { %v2628_v11 = vpack.c.bf16 %v2612_v9, %v2611_v15 }
 0x428   : > { %v2627_v31 = vpack.c.bf16 %v2610_v37, %v2609_v63 }
 0x42a   : > { %3500 = vmatprep.mubr.bf16.mxu1 %v2627_v31 }
 0x42b   : > { %3501 = vmatmul.mubr.bf16.gmra.mrb[92].mxu1 %v2628_v11 }
 0x4c6   : > { %v3474_v57 = vpop.f32.mrb[64].mxu1 }
 0x4c7   : > { %v2736_v18 = vadd.f32 %v3474_v57, %v4522_v56  ;;  %v2727_v40 = vpop.f32.mrb[65].mxu1 }
 0x4c8   : > { %v2728_v42 = vadd.f32 %v4522_v56, %v2727_v40  ;;  %v3475_v35 = vpop.f32.mrb[66].mxu1 }
 0x4c9   : > { %3040 = vst.msk [vmem:[%s4535_s12 + $0x110] sm:$0xff] %vm1553_vm0, %v2736_v18  ;;  %v2739_v5 = vadd.f32 %v3475_v35, %v4522_v56  ;;  %v2730_v39 = vpop.f32.mrb[67].mxu1 }
 0x4ca   : > { %3038 = vst.msk [vmem:[%s4535_s12 + $0x100] sm:$0xff] %vm1553_vm0, %v2728_v42  ;;  %v2731_v54 = vadd.f32 %v4522_v56, %v2730_v39 }
 0x4cb   : > { %3041 = vst.msk [vmem:[%s4535_s12 + $0x118] sm:$0xff] %vm1553_vm0, %v2739_v5 }
 0x4cc   : > { %3039 = vst.msk [vmem:[%s4535_s12 + $0x108] sm:$0xff] %vm1553_vm0, %v2731_v54 }
 0x4ce   : > { %v3478_v23 = vpop.f32.mrb[68].mxu1 }
 0x4cf   : > { %v2752_v25 = vadd.f32 %v3478_v23, %v4522_v56  ;;  %v2743_v20 = vpop.f32.mrb[69].mxu1 }
 0x4d0   : > { %v2744_v22 = vadd.f32 %v4522_v56, %v2743_v20  ;;  %v3479_v44 = vpop.f32.mrb[70].mxu1 }
 0x4d1   : > { %3044 = vst.msk [vmem:[%s4535_s12 + $0x130] sm:$0xff] %vm1553_vm0, %v2752_v25  ;;  %v2755_v24 = vadd.f32 %v3479_v44, %v4522_v56  ;;  %v2746_v4 = vpop.f32.mrb[71].mxu1 }
 0x4d2   : > { %3042 = vst.msk [vmem:[%s4535_s12 + $0x120] sm:$0xff] %vm1553_vm0, %v2744_v22  ;;  %v2747_v28 = vadd.f32 %v4522_v56, %v2746_v4 }
 0x4d3   : > { %3045 = vst.msk [vmem:[%s4535_s12 + $0x138] sm:$0xff] %vm1553_vm0, %v2755_v24 }
 0x4d4   : > { %3043 = vst.msk [vmem:[%s4535_s12 + $0x128] sm:$0xff] %vm1553_vm0, %v2747_v28 }
 0x4d6   : > { %v3482_v48 = vpop.f32.mrb[72].mxu1 }
 0x4d7   : > { %v2768_v59 = vadd.f32 %v3482_v48, %v4522_v56  ;;  %v2759_v49 = vpop.f32.mrb[73].mxu1 }
 0x4d8   : > { %v2760_v13 = vadd.f32 %v4522_v56, %v2759_v49  ;;  %v3483_v12 = vpop.f32.mrb[74].mxu1 }
 0x4d9   : > { %3048 = vst.msk [vmem:[%s4535_s12 + $0x150] sm:$0xff] %vm1553_vm0, %v2768_v59  ;;  %v2771_v34 = vadd.f32 %v3483_v12, %v4522_v56  ;;  %v2762_v46 = vpop.f32.mrb[75].mxu1 }
 0x4da   : > { %3046 = vst.msk [vmem:[%s4535_s12 + $0x140] sm:$0xff] %vm1553_vm0, %v2760_v13  ;;  %v2763_v17 = vadd.f32 %v4522_v56, %v2762_v46 }
 0x4db   : > { %3049 = vst.msk [vmem:[%s4535_s12 + $0x158] sm:$0xff] %vm1553_vm0, %v2771_v34 }
 0x4dc   : > { %3047 = vst.msk [vmem:[%s4535_s12 + $0x148] sm:$0xff] %vm1553_vm0, %v2763_v17 }
 0x4de   : > { %v3486_v27 = vpop.f32.mrb[76].mxu1 }
 0x4df   : > { %v2784_v1 = vadd.f32 %v3486_v27, %v4522_v56  ;;  %v2775_v30 = vpop.f32.mrb[77].mxu1 }
 0x4e0   : > { %v2776_v33 = vadd.f32 %v4522_v56, %v2775_v30  ;;  %v3487_v58 = vpop.f32.mrb[78].mxu1 }
 0x4e1   : > { %3052 = vst.msk [vmem:[%s4535_s12 + $0x170] sm:$0xff] %vm1553_vm0, %v2784_v1  ;;  %v2787_v50 = vadd.f32 %v3487_v58, %v4522_v56  ;;  %v2778_v36 = vpop.f32.mrb[79].mxu1 }
 0x4e2   : > { %3050 = vst.msk [vmem:[%s4535_s12 + $0x160] sm:$0xff] %vm1553_vm0, %v2776_v33  ;;  %v2779_v38 = vadd.f32 %v4522_v56, %v2778_v36 }
 0x4e3   : > { %3053 = vst.msk [vmem:[%s4535_s12 + $0x178] sm:$0xff] %vm1553_vm0, %v2787_v50 }
 0x4e4   : > { %3051 = vst.msk [vmem:[%s4535_s12 + $0x168] sm:$0xff] %vm1553_vm0, %v2779_v38 }
 0x4e6   : > { %v3490_v43 = vpop.f32.mrb[80].mxu1 }
 0x4e7   : > { %v2800_v55 = vadd.f32 %v3490_v43, %v4522_v56  ;;  %v2791_v2 = vpop.f32.mrb[81].mxu1 }
 0x4e8   : > { %v2792_v60 = vadd.f32 %v4522_v56, %v2791_v2  ;;  %v3491_v61 = vpop.f32.mrb[82].mxu1 }
 0x4e9   : > { %3056 = vst.msk [vmem:[%s4535_s12 + $0x190] sm:$0xff] %vm1553_vm0, %v2800_v55  ;;  %v2803_v3 = vadd.f32 %v3491_v61, %v4522_v56  ;;  %v2794_v51 = vpop.f32.mrb[83].mxu1 }
 0x4ea   : > { %3054 = vst.msk [vmem:[%s4535_s12 + $0x180] sm:$0xff] %vm1553_vm0, %v2792_v60  ;;  %v2795_v29 = vadd.f32 %v4522_v56, %v2794_v51 }
 0x4eb   : > { %3057 = vst.msk [vmem:[%s4535_s12 + $0x198] sm:$0xff] %vm1553_vm0, %v2803_v3 }
 0x4ec   : > { %3055 = vst.msk [vmem:[%s4535_s12 + $0x188] sm:$0xff] %vm1553_vm0, %v2795_v29 }
 0x4ee   : > { %v3494_v16 = vpop.f32.mrb[84].mxu1 }
 0x4ef   : > { %v2816_v53 = vadd.f32 %v3494_v16, %v4522_v56  ;;  %v2807_v19 = vpop.f32.mrb[85].mxu1 }
 0x4f0   : > { %v2808_v8 = vadd.f32 %v4522_v56, %v2807_v19  ;;  %v3495_v6 = vpop.f32.mrb[86].mxu1 }
 0x4f1   : > { %3060 = vst.msk [vmem:[%s4535_s12 + $0x1b0] sm:$0xff] %vm1553_vm0, %v2816_v53  ;;  %v2819_v21 = vadd.f32 %v3495_v6, %v4522_v56  ;;  %v2810_v7 = vpop.f32.mrb[87].mxu1 }
 0x4f2   : > { %3058 = vst.msk [vmem:[%s4535_s12 + $0x1a0] sm:$0xff] %vm1553_vm0, %v2808_v8  ;;  %v2811_v10 = vadd.f32 %v4522_v56, %v2810_v7 }
 0x4f3   : > { %3061 = vst.msk [vmem:[%s4535_s12 + $0x1b8] sm:$0xff] %vm1553_vm0, %v2819_v21 }
 0x4f4   : > { %3059 = vst.msk [vmem:[%s4535_s12 + $0x1a8] sm:$0xff] %vm1553_vm0, %v2811_v10 }
 0x4f6   : > { %v3498_v0 = vpop.f32.mrb[88].mxu1 }
 0x4f7   : > { %v2832_v62 = vadd.f32 %v3498_v0, %v4522_v56  ;;  %v2823_v26 = vpop.f32.mrb[89].mxu1 }
 0x4f8   : > { %v2824_v41 = vadd.f32 %v4522_v56, %v2823_v26  ;;  %v3499_v45 = vpop.f32.mrb[90].mxu1 }
 0x4f9   : > { %3064 = vst.msk [vmem:[%s4535_s12 + $0x1d0] sm:$0xff] %vm1553_vm0, %v2832_v62  ;;  %v2835_v47 = vadd.f32 %v3499_v45, %v4522_v56  ;;  %v2826_v32 = vpop.f32.mrb[91].mxu1 }
 0x4fa   : > { %3062 = vst.msk [vmem:[%s4535_s12 + $0x1c0] sm:$0xff] %vm1553_vm0, %v2824_v41  ;;  %v2827_v14 = vadd.f32 %v4522_v56, %v2826_v32 }
 0x4fb   : > { %3065 = vst.msk [vmem:[%s4535_s12 + $0x1d8] sm:$0xff] %vm1553_vm0, %v2835_v47 }
 0x4fc   : > { %3063 = vst.msk [vmem:[%s4535_s12 + $0x1c8] sm:$0xff] %vm1553_vm0, %v2827_v14 }
 0x4fe   : > { %v3502_v52 = vpop.f32.mrb[92].mxu1 }
 0x4ff   : > { %v2848_v15 = vadd.f32 %v3502_v52, %v4522_v56  ;;  %v2839_v9 = vpop.f32.mrb[93].mxu1 }
 0x500   : > { %v2840_v63 = vadd.f32 %v4522_v56, %v2839_v9  ;;  %v3503_v37 = vpop.f32.mrb[94].mxu1 }
 0x501   : > { %3068 = vst.msk [vmem:[%s4535_s12 + $0x1f0] sm:$0xff] %vm1553_vm0, %v2848_v15  ;;  %v2851_v11 = vadd.f32 %v3503_v37, %v4522_v56  ;;  %v2842_v31 = vpop.f32.mrb[95].mxu1 }
 0x502   : > { %3066 = vst.msk [vmem:[%s4535_s12 + $0x1e0] sm:$0xff] %vm1553_vm0, %v2840_v63  ;;  %v2843_v57 = vadd.f32 %v4522_v56, %v2842_v31 }
 0x503   : > { %3069 = vst.msk [vmem:[%s4535_s12 + $0x1f8] sm:$0xff] %vm1553_vm0, %v2851_v11 }
 0x504   : > { %3067 = vst.msk [vmem:[%s4535_s12 + $0x1e8] sm:$0xff] %vm1553_vm0, %v2843_v57 }
 0x505 PF: > { %s16_s21 = sadd.s32 1, %s3641_s21  }
 0x506   : > { %p13_p4 = scmp.ge.s32.totalorder %s16_s21, 10  }
 0x508   :  { %15 = sbr.rel (!%p13_p4) target bundleno = 1 (0x1), region = 76 }

</bundles_post_ra>
